<compile_context>
chip_gen: v7x
topology: tpu7x:2x2x1
jax: 0.10.0
libtpu: 0.0.40
codegen_flags: <defaults>
</compile_context>

<pallas_src>
import functools

import numpy as np
import jax
import jax.numpy as jnp
from jax import lax
from jax.experimental import pallas as pl
from jax.experimental.pallas import tpu as pltpu

# ---- config (small, consistent with the module) ----
VOCAB_SIZE = 64
N_EMBD = 32
N_HEADS = 4
HEAD_SIZE = N_EMBD // N_HEADS
BLOCK_SIZE = 8          # sequence length T
N_BLOCKS = 2
BATCH = 2
LN_EPS = 1e-5           # torch.nn.LayerNorm default
LANES = 128             # TPU lane width / packed-buffer column count


def _layernorm(x, w, b):
    mu = jnp.mean(x, axis=-1, keepdims=True)
    var = jnp.mean((x - mu) ** 2, axis=-1, keepdims=True)
    return (x - mu) * lax.rsqrt(var + LN_EPS) * w + b


# ---------------------------------------------------------------------------
# Packed-weight layout: every parameter lives at a static (row, lane) offset
# inside one (PACKED_ROWS, 128) f32 buffer.  Rows are 8-aligned per array.
# ---------------------------------------------------------------------------
def _build_layout():
    C, F, V, D = N_EMBD, 4 * N_EMBD, VOCAB_SIZE, HEAD_SIZE
    entries = [('tok_table', V, C), ('pos_table', BLOCK_SIZE, C)]
    for b in range(N_BLOCKS):
        entries += [(f'ln1w_{b}', 1, C), (f'ln1b_{b}', 1, C)]
        for h in range(N_HEADS):
            entries += [(f'wq_{b}_{h}', C, D), (f'wk_{b}_{h}', C, D),
                        (f'wv_{b}_{h}', C, D)]
        entries += [(f'wo_{b}', C, C), (f'bo_{b}', 1, C),
                    (f'ln2w_{b}', 1, C), (f'ln2b_{b}', 1, C),
                    (f'w1_{b}', C, F), (f'b1_{b}', 1, F),
                    (f'w2_{b}', F, C), (f'b2_{b}', 1, C)]
    entries += [('lnf_w', 1, C), ('lnf_b', 1, C),
                ('w_head', C, V), ('b_head', 1, V)]
    offsets, off = {}, 0
    for name, rows, cols in entries:
        offsets[name] = (off, rows, cols)
        off += (rows + 7) // 8 * 8          # 8-aligned row offsets
    return offsets, off


_OFFSETS, PACKED_ROWS = _build_layout()     # PACKED_ROWS = 1392 -> ~0.7 MiB


def pack_weights(weights):
    """Pack the parameter dict into the single tile-aligned f32 buffer."""
    buf = np.zeros((PACKED_ROWS, LANES), np.float32)

    def put(name, arr):
        off, r, c = _OFFSETS[name]
        buf[off:off + r, :c] = np.asarray(arr, np.float32).reshape(r, c)

    put('tok_table', weights['tok_table'])
    put('pos_table', weights['pos_table'])
    for b, blk in enumerate(weights['blocks']):
        put(f'ln1w_{b}', blk['ln1w']); put(f'ln1b_{b}', blk['ln1b'])
        for h in range(N_HEADS):
            put(f'wq_{b}_{h}', blk['wq'][h])
            put(f'wk_{b}_{h}', blk['wk'][h])
            put(f'wv_{b}_{h}', blk['wv'][h])
        put(f'wo_{b}', blk['wo']); put(f'bo_{b}', blk['bo'])
        put(f'ln2w_{b}', blk['ln2w']); put(f'ln2b_{b}', blk['ln2b'])
        put(f'w1_{b}', blk['w1']); put(f'b1_{b}', blk['b1'])
        put(f'w2_{b}', blk['w2']); put(f'b2_{b}', blk['b2'])
    put('lnf_w', weights['lnf_w']); put('lnf_b', weights['lnf_b'])
    put('w_head', weights['w_head']); put('b_head', weights['b_head'])
    return jnp.asarray(buf)


# ---------------------------------------------------------------------------
# Single fused kernel: embedding + all blocks + final LayerNorm + lm_head.
# ---------------------------------------------------------------------------
def decoder_kernel(idx_ref, w_ref, out_ref, *, batch, seq):
    B, T = batch, seq
    BT = B * T
    C, H, D, V = N_EMBD, N_HEADS, HEAD_SIZE, VOCAB_SIZE
    scale = D ** (-0.5)

    def w(name, lanes=None):
        off, r, c = _OFFSETS[name]
        return w_ref[off:off + r, 0:(c if lanes is None else lanes)]

    # ---- fused embedding: one-hot gather (MXU is idle -> free) + pos add ----
    idx_col = idx_ref[...]                                     # (BT, 1) int32
    vocab_iota = lax.broadcasted_iota(jnp.int32, (BT, V), 1)
    onehot = (idx_col == vocab_iota).astype(jnp.float32)       # (BT, V)
    x = jnp.dot(onehot, w('tok_table'),
                preferred_element_type=jnp.float32)            # (BT, C)
    pos_off = _OFFSETS['pos_table'][0]
    pos = w_ref[pos_off:pos_off + T, 0:C]                      # (T, C)
    x = x + jnp.concatenate([pos] * B, axis=0)                 # broadcast over batch

    # additive causal mask, hoisted once (single add per layer later)
    row = lax.broadcasted_iota(jnp.int32, (T, T), 0)
    col = lax.broadcasted_iota(jnp.int32, (T, T), 1)
    mask_add = jnp.where(row >= col, 0.0, -1e30).astype(jnp.float32)[None, :, :]

    for b in range(N_BLOCKS):                  # static unroll over layers
        # ---- LN1 + multi-head causal self-attention (all heads batched) ----
        xn = _layernorm(x, w(f'ln1w_{b}'), w(f'ln1b_{b}'))     # (BT, C)
        qs, ks, vs = [], [], []
        for h in range(H):                     # per-head weights at lane 0
            qs.append(jnp.dot(xn, w(f'wq_{b}_{h}'),
                              preferred_element_type=jnp.float32).reshape(B, T, D))
            ks.append(jnp.dot(xn, w(f'wk_{b}_{h}'),
                              preferred_element_type=jnp.float32).reshape(B, T, D))
            vs.append(jnp.dot(xn, w(f'wv_{b}_{h}'),
                              preferred_element_type=jnp.float32).reshape(B, T, D))
        # leading-axis concat is cheap (no lane/sublane movement)
        q = jnp.concatenate(qs, axis=0)                        # (H*B, T, D)
        k = jnp.concatenate(ks, axis=0)
        v = jnp.concatenate(vs, axis=0)

        s = jnp.einsum('bqd,bkd->bqk', q, k,
                       preferred_element_type=jnp.float32) * scale + mask_add
        m = jnp.max(s, axis=-1, keepdims=True)
        e = jnp.exp(s - m)
        p = e * pl.reciprocal(jnp.sum(e, axis=-1, keepdims=True), approx=True)
        o = jnp.einsum('bqk,bkd->bqd', p, v,
                       preferred_element_type=jnp.float32)     # (H*B, T, D)

        # materialize the all-head output and do ONE K=C output projection
        attn = jnp.concatenate(
            [o[h * B:(h + 1) * B].reshape(BT, D) for h in range(H)], axis=1)
        x = x + jnp.dot(attn, w(f'wo_{b}'),
                        preferred_element_type=jnp.float32) + w(f'bo_{b}')
        # TODO(synk): nn.Dropout is identity in eval mode; not implemented.

        # ---- LN2 + feed-forward (ReLU) ----
        xn2 = _layernorm(x, w(f'ln2w_{b}'), w(f'ln2b_{b}'))
        hid = jnp.maximum(
            jnp.dot(xn2, w(f'w1_{b}'),
                    preferred_element_type=jnp.float32) + w(f'b1_{b}'), 0.0)
        x = x + jnp.dot(hid, w(f'w2_{b}'),
                        preferred_element_type=jnp.float32) + w(f'b2_{b}')

    # ---- final LayerNorm + lm_head (lane-dense 128-wide output slab) ----
    xn = _layernorm(x, w('lnf_w'), w('lnf_b'))
    out_ref[...] = jnp.dot(xn, w('w_head', lanes=LANES),
                           preferred_element_type=jnp.float32) + w('b_head', lanes=LANES)


# ---------------------------------------------------------------------------
# Wrapper — replicates Decoder.forward(idx, targets=None) -> (logits, None)
# ---------------------------------------------------------------------------
@jax.jit
def decoder_forward(idx, packed_weights):
    B, T = idx.shape
    assert T <= BLOCK_SIZE
    idx2d = idx.reshape(B * T, 1).astype(jnp.int32)

    vmem = pl.BlockSpec(memory_space=pltpu.MemorySpace.VMEM)
    logits_pad = pl.pallas_call(
        functools.partial(decoder_kernel, batch=B, seq=T),
        out_shape=jax.ShapeDtypeStruct((B * T, LANES), jnp.float32),
        in_specs=[vmem, vmem],
        out_specs=vmem,
    )(idx2d, packed_weights)

    logits = logits_pad[:, :VOCAB_SIZE].reshape(B, T, VOCAB_SIZE)
    return logits, None   # targets=None path -> loss=None


# ---------------------------------------------------------------------------
# Pure-JAX reference (mirrors the PyTorch module) for a sanity check
# ---------------------------------------------------------------------------
def reference_forward(idx, weights):
    B, T = idx.shape
    x = weights['tok_table'][idx] + weights['pos_table'][jnp.arange(T)][None]
    tril = jnp.tril(jnp.ones((T, T), bool))
    for b in range(N_BLOCKS):
        blk = weights['blocks'][b]
        xn = _layernorm(x, blk['ln1w'], blk['ln1b'])
        heads = []
        for h in range(N_HEADS):
            q = xn @ blk['wq'][h]
            k = xn @ blk['wk'][h]
            v = xn @ blk['wv'][h]
            s = jnp.einsum('bqd,bkd->bqk', q, k) * HEAD_SIZE ** (-0.5)
            s = jnp.where(tril[None], s, -jnp.inf)
            p = jax.nn.softmax(s, axis=-1)
            heads.append(jnp.einsum('bqk,bkd->bqd', p, v))
        attn = jnp.concatenate(heads, axis=-1) @ blk['wo'] + blk['bo']
        x = x + attn
        xn2 = _layernorm(x, blk['ln2w'], blk['ln2b'])
        hid = jnp.maximum(xn2 @ blk['w1'] + blk['b1'], 0.0)
        x = x + hid @ blk['w2'] + blk['b2']
    xn = _layernorm(x, weights['lnf_w'], weights['lnf_b'])
    return xn @ weights['w_head'] + weights['b_head']


# ---------------------------------------------------------------------------
# Deterministic parameter init (PyTorch-module-shaped: per-head Q/K/V Linears)
# ---------------------------------------------------------------------------
def init_weights(key):
    C, F, V, D = N_EMBD, 4 * N_EMBD, VOCAB_SIZE, HEAD_SIZE
    keys = iter(jax.random.split(key, 64))
    nrm = lambda shape, s=0.02: (s * jax.random.normal(next(keys), shape)).astype(jnp.float32)
    blocks = []
    for _ in range(N_BLOCKS):
        blocks.append({
            'ln1w': jnp.ones((C,), jnp.float32), 'ln1b': jnp.zeros((C,), jnp.float32),
            'wq': nrm((N_HEADS, C, D)), 'wk': nrm((N_HEADS, C, D)), 'wv': nrm((N_HEADS, C, D)),
            'wo': nrm((C, C)), 'bo': nrm((C,)),
            'ln2w': jnp.ones((C,), jnp.float32), 'ln2b': jnp.zeros((C,), jnp.float32),
            'w1': nrm((C, F)), 'b1': nrm((F,)),
            'w2': nrm((F, C)), 'b2': nrm((C,)),
        })
    return {
        'tok_table': nrm((V, C)),
        'pos_table': nrm((BLOCK_SIZE, C)),
        'blocks': blocks,
        'lnf_w': jnp.ones((C,), jnp.float32), 'lnf_b': jnp.zeros((C,), jnp.float32),
        'w_head': nrm((C, V)), 'b_head': jnp.zeros((V,), jnp.float32),
    }


if __name__ == "__main__":
    key = jax.random.PRNGKey(0)
    wkey, ikey = jax.random.split(key)
    weights = init_weights(wkey)
    packed = pack_weights(weights)           # one-time host-side packing
    idx = jax.random.randint(ikey, (BATCH, BLOCK_SIZE), 0, VOCAB_SIZE,
                             dtype=jnp.int32)

    logits, loss = decoder_forward(idx, packed)
    logits = jax.block_until_ready(logits)

    ref = jax.block_until_ready(reference_forward(idx, weights))
    assert logits.shape == (BATCH, BLOCK_SIZE, VOCAB_SIZE)
    assert loss is None
    assert jnp.allclose(logits, ref, atol=1e-2, rtol=1e-2), \
        float(jnp.max(jnp.abs(logits - ref)))

    print("KERNEL_OK")
</pallas_src>

<mosaic_0001>
module attributes {stable_mosaic.version = 11 : i64} {
  func.func @decoder_kernel(%arg0: memref<16x1xi32, #tpu.memory_space<vmem>>, %arg1: memref<1392x128xf32, #tpu.memory_space<vmem>>, %arg2: memref<16x128xf32, #tpu.memory_space<vmem>>) attributes {dimension_semantics = [], scalar_prefetch = 0 : i64, scratch_operands = 0 : i64, tpu.core_type = #tpu.core_type<tc>} {
    %c0 = arith.constant 0 : index
    %c0_0 = arith.constant 0 : index
    %0 = vector.load %arg0[%c0, %c0_0] : memref<16x1xi32, #tpu.memory_space<vmem>>, vector<16x1xi32>
    %1 = tpu.iota {dimensions = array<i32: 1>} : vector<16x64xi32>
    %2 = vector.broadcast %0 : vector<16x1xi32> to vector<16x64xi32>
    %3 = arith.cmpi eq, %2, %1 : vector<16x64xi32>
    %4 = arith.extui %3 : vector<16x64xi1> to vector<16x64xi32>
    %5 = arith.sitofp %4 : vector<16x64xi32> to vector<16x64xf32>
    %c0_1 = arith.constant 0 : index
    %c0_2 = arith.constant 0 : index
    %6 = vector.load %arg1[%c0_1, %c0_2] : memref<1392x128xf32, #tpu.memory_space<vmem>>, vector<64x32xf32>
    %cst = arith.constant dense<0.000000e+00> : vector<16x32xf32>
    %7 = tpu.matmul %5, %6, %cst {dimension_numbers = #tpu.dot_dimension_numbers<[1], [0], [0], [1], [0, 0, 1, 1], [], []>} : vector<16x64xf32>, vector<64x32xf32>, vector<16x32xf32> -> vector<16x32xf32>
    %c64 = arith.constant 64 : index
    %c0_3 = arith.constant 0 : index
    %8 = vector.load %arg1[%c64, %c0_3] : memref<1392x128xf32, #tpu.memory_space<vmem>>, vector<8x32xf32>
    %9 = tpu.concatenate %8, %8 in 0 : vector<8x32xf32>, vector<8x32xf32> -> vector<16x32xf32>
    %10 = arith.addf %7, %9 : vector<16x32xf32>
    %11 = tpu.iota {dimensions = array<i32: 0>} : vector<8x8xi32>
    %12 = tpu.iota {dimensions = array<i32: 1>} : vector<8x8xi32>
    %13 = arith.cmpi sge, %11, %12 : vector<8x8xi32>
    %cst_4 = arith.constant 0.000000e+00 : f32
    %cst_5 = arith.constant -1.000000e+30 : f32
    %14 = vector.broadcast %cst_4 : f32 to vector<8x8xf32>
    %15 = vector.broadcast %cst_5 : f32 to vector<8x8xf32>
    %16 = arith.select %13, %14, %15 : vector<8x8xi1>, vector<8x8xf32>
    %17 = vector.shape_cast %16 : vector<8x8xf32> to vector<1x8x8xf32>
    %c72 = arith.constant 72 : index
    %c0_6 = arith.constant 0 : index
    %18 = vector.load %arg1[%c72, %c0_6] : memref<1392x128xf32, #tpu.memory_space<vmem>>, vector<1x32xf32>
    %c80 = arith.constant 80 : index
    %c0_7 = arith.constant 0 : index
    %19 = vector.load %arg1[%c80, %c0_7] : memref<1392x128xf32, #tpu.memory_space<vmem>>, vector<1x32xf32>
    %cst_8 = arith.constant dense<0.000000e+00> : vector<16xf32>
    %20 = vector.multi_reduction <add>, %10, %cst_8 [1] : vector<16x32xf32> to vector<16xf32>
    %21 = vector.shape_cast %20 : vector<16xf32> to vector<16x1xf32>
    %cst_9 = arith.constant 3.200000e+01 : f32
    %22 = vector.broadcast %cst_9 : f32 to vector<16x1xf32>
    %23 = arith.divf %21, %22 : vector<16x1xf32>
    %24 = vector.broadcast %23 : vector<16x1xf32> to vector<16x32xf32>
    %25 = arith.subf %10, %24 : vector<16x32xf32>
    %26 = arith.mulf %25, %25 : vector<16x32xf32>
    %cst_10 = arith.constant dense<0.000000e+00> : vector<16xf32>
    %27 = vector.multi_reduction <add>, %26, %cst_10 [1] : vector<16x32xf32> to vector<16xf32>
    %28 = vector.shape_cast %27 : vector<16xf32> to vector<16x1xf32>
    %cst_11 = arith.constant 3.200000e+01 : f32
    %29 = vector.broadcast %cst_11 : f32 to vector<16x1xf32>
    %30 = arith.divf %28, %29 : vector<16x1xf32>
    %31 = vector.broadcast %23 : vector<16x1xf32> to vector<16x32xf32>
    %32 = arith.subf %10, %31 : vector<16x32xf32>
    %cst_12 = arith.constant 9.99999974E-6 : f32
    %33 = vector.broadcast %cst_12 : f32 to vector<16x1xf32>
    %34 = arith.addf %30, %33 : vector<16x1xf32>
    %35 = math.rsqrt %34 : vector<16x1xf32>
    %36 = vector.broadcast %35 : vector<16x1xf32> to vector<16x32xf32>
    %37 = arith.mulf %32, %36 : vector<16x32xf32>
    %38 = vector.broadcast %18 : vector<1x32xf32> to vector<16x32xf32>
    %39 = arith.mulf %37, %38 : vector<16x32xf32>
    %40 = vector.broadcast %19 : vector<1x32xf32> to vector<16x32xf32>
    %41 = arith.addf %39, %40 : vector<16x32xf32>
    %c88 = arith.constant 88 : index
    %c0_13 = arith.constant 0 : index
    %42 = vector.load %arg1[%c88, %c0_13] : memref<1392x128xf32, #tpu.memory_space<vmem>>, vector<32x8xf32>
    %cst_14 = arith.constant dense<0.000000e+00> : vector<16x8xf32>
    %43 = tpu.matmul %41, %42, %cst_14 {dimension_numbers = #tpu.dot_dimension_numbers<[1], [0], [0], [1], [0, 0, 1, 1], [], []>} : vector<16x32xf32>, vector<32x8xf32>, vector<16x8xf32> -> vector<16x8xf32>
    %44 = vector.shape_cast %43 : vector<16x8xf32> to vector<2x8x8xf32>
    %c120 = arith.constant 120 : index
    %c0_15 = arith.constant 0 : index
    %45 = vector.load %arg1[%c120, %c0_15] : memref<1392x128xf32, #tpu.memory_space<vmem>>, vector<32x8xf32>
    %cst_16 = arith.constant dense<0.000000e+00> : vector<16x8xf32>
    %46 = tpu.matmul %41, %45, %cst_16 {dimension_numbers = #tpu.dot_dimension_numbers<[1], [0], [0], [1], [0, 0, 1, 1], [], []>} : vector<16x32xf32>, vector<32x8xf32>, vector<16x8xf32> -> vector<16x8xf32>
    %47 = vector.shape_cast %46 : vector<16x8xf32> to vector<2x8x8xf32>
    %c152 = arith.constant 152 : index
    %c0_17 = arith.constant 0 : index
    %48 = vector.load %arg1[%c152, %c0_17] : memref<1392x128xf32, #tpu.memory_space<vmem>>, vector<32x8xf32>
    %cst_18 = arith.constant dense<0.000000e+00> : vector<16x8xf32>
    %49 = tpu.matmul %41, %48, %cst_18 {dimension_numbers = #tpu.dot_dimension_numbers<[1], [0], [0], [1], [0, 0, 1, 1], [], []>} : vector<16x32xf32>, vector<32x8xf32>, vector<16x8xf32> -> vector<16x8xf32>
    %50 = vector.shape_cast %49 : vector<16x8xf32> to vector<2x8x8xf32>
    %c184 = arith.constant 184 : index
    %c0_19 = arith.constant 0 : index
    %51 = vector.load %arg1[%c184, %c0_19] : memref<1392x128xf32, #tpu.memory_space<vmem>>, vector<32x8xf32>
    %cst_20 = arith.constant dense<0.000000e+00> : vector<16x8xf32>
    %52 = tpu.matmul %41, %51, %cst_20 {dimension_numbers = #tpu.dot_dimension_numbers<[1], [0], [0], [1], [0, 0, 1, 1], [], []>} : vector<16x32xf32>, vector<32x8xf32>, vector<16x8xf32> -> vector<16x8xf32>
    %53 = vector.shape_cast %52 : vector<16x8xf32> to vector<2x8x8xf32>
    %c216 = arith.constant 216 : index
    %c0_21 = arith.constant 0 : index
    %54 = vector.load %arg1[%c216, %c0_21] : memref<1392x128xf32, #tpu.memory_space<vmem>>, vector<32x8xf32>
    %cst_22 = arith.constant dense<0.000000e+00> : vector<16x8xf32>
    %55 = tpu.matmul %41, %54, %cst_22 {dimension_numbers = #tpu.dot_dimension_numbers<[1], [0], [0], [1], [0, 0, 1, 1], [], []>} : vector<16x32xf32>, vector<32x8xf32>, vector<16x8xf32> -> vector<16x8xf32>
    %56 = vector.shape_cast %55 : vector<16x8xf32> to vector<2x8x8xf32>
    %c248 = arith.constant 248 : index
    %c0_23 = arith.constant 0 : index
    %57 = vector.load %arg1[%c248, %c0_23] : memref<1392x128xf32, #tpu.memory_space<vmem>>, vector<32x8xf32>
    %cst_24 = arith.constant dense<0.000000e+00> : vector<16x8xf32>
    %58 = tpu.matmul %41, %57, %cst_24 {dimension_numbers = #tpu.dot_dimension_numbers<[1], [0], [0], [1], [0, 0, 1, 1], [], []>} : vector<16x32xf32>, vector<32x8xf32>, vector<16x8xf32> -> vector<16x8xf32>
    %59 = vector.shape_cast %58 : vector<16x8xf32> to vector<2x8x8xf32>
    %c280 = arith.constant 280 : index
    %c0_25 = arith.constant 0 : index
    %60 = vector.load %arg1[%c280, %c0_25] : memref<1392x128xf32, #tpu.memory_space<vmem>>, vector<32x8xf32>
    %cst_26 = arith.constant dense<0.000000e+00> : vector<16x8xf32>
    %61 = tpu.matmul %41, %60, %cst_26 {dimension_numbers = #tpu.dot_dimension_numbers<[1], [0], [0], [1], [0, 0, 1, 1], [], []>} : vector<16x32xf32>, vector<32x8xf32>, vector<16x8xf32> -> vector<16x8xf32>
    %62 = vector.shape_cast %61 : vector<16x8xf32> to vector<2x8x8xf32>
    %c312 = arith.constant 312 : index
    %c0_27 = arith.constant 0 : index
    %63 = vector.load %arg1[%c312, %c0_27] : memref<1392x128xf32, #tpu.memory_space<vmem>>, vector<32x8xf32>
    %cst_28 = arith.constant dense<0.000000e+00> : vector<16x8xf32>
    %64 = tpu.matmul %41, %63, %cst_28 {dimension_numbers = #tpu.dot_dimension_numbers<[1], [0], [0], [1], [0, 0, 1, 1], [], []>} : vector<16x32xf32>, vector<32x8xf32>, vector<16x8xf32> -> vector<16x8xf32>
    %65 = vector.shape_cast %64 : vector<16x8xf32> to vector<2x8x8xf32>
    %c344 = arith.constant 344 : index
    %c0_29 = arith.constant 0 : index
    %66 = vector.load %arg1[%c344, %c0_29] : memref<1392x128xf32, #tpu.memory_space<vmem>>, vector<32x8xf32>
    %cst_30 = arith.constant dense<0.000000e+00> : vector<16x8xf32>
    %67 = tpu.matmul %41, %66, %cst_30 {dimension_numbers = #tpu.dot_dimension_numbers<[1], [0], [0], [1], [0, 0, 1, 1], [], []>} : vector<16x32xf32>, vector<32x8xf32>, vector<16x8xf32> -> vector<16x8xf32>
    %68 = vector.shape_cast %67 : vector<16x8xf32> to vector<2x8x8xf32>
    %c376 = arith.constant 376 : index
    %c0_31 = arith.constant 0 : index
    %69 = vector.load %arg1[%c376, %c0_31] : memref<1392x128xf32, #tpu.memory_space<vmem>>, vector<32x8xf32>
    %cst_32 = arith.constant dense<0.000000e+00> : vector<16x8xf32>
    %70 = tpu.matmul %41, %69, %cst_32 {dimension_numbers = #tpu.dot_dimension_numbers<[1], [0], [0], [1], [0, 0, 1, 1], [], []>} : vector<16x32xf32>, vector<32x8xf32>, vector<16x8xf32> -> vector<16x8xf32>
    %71 = vector.shape_cast %70 : vector<16x8xf32> to vector<2x8x8xf32>
    %c408 = arith.constant 408 : index
    %c0_33 = arith.constant 0 : index
    %72 = vector.load %arg1[%c408, %c0_33] : memref<1392x128xf32, #tpu.memory_space<vmem>>, vector<32x8xf32>
    %cst_34 = arith.constant dense<0.000000e+00> : vector<16x8xf32>
    %73 = tpu.matmul %41, %72, %cst_34 {dimension_numbers = #tpu.dot_dimension_numbers<[1], [0], [0], [1], [0, 0, 1, 1], [], []>} : vector<16x32xf32>, vector<32x8xf32>, vector<16x8xf32> -> vector<16x8xf32>
    %74 = vector.shape_cast %73 : vector<16x8xf32> to vector<2x8x8xf32>
    %c440 = arith.constant 440 : index
    %c0_35 = arith.constant 0 : index
    %75 = vector.load %arg1[%c440, %c0_35] : memref<1392x128xf32, #tpu.memory_space<vmem>>, vector<32x8xf32>
    %cst_36 = arith.constant dense<0.000000e+00> : vector<16x8xf32>
    %76 = tpu.matmul %41, %75, %cst_36 {dimension_numbers = #tpu.dot_dimension_numbers<[1], [0], [0], [1], [0, 0, 1, 1], [], []>} : vector<16x32xf32>, vector<32x8xf32>, vector<16x8xf32> -> vector<16x8xf32>
    %77 = vector.shape_cast %76 : vector<16x8xf32> to vector<2x8x8xf32>
    %78 = tpu.concatenate %44, %53, %62, %71 in 0 : vector<2x8x8xf32>, vector<2x8x8xf32>, vector<2x8x8xf32>, vector<2x8x8xf32> -> vector<8x8x8xf32>
    %79 = tpu.concatenate %47, %56, %65, %74 in 0 : vector<2x8x8xf32>, vector<2x8x8xf32>, vector<2x8x8xf32>, vector<2x8x8xf32> -> vector<8x8x8xf32>
    %80 = tpu.concatenate %50, %59, %68, %77 in 0 : vector<2x8x8xf32>, vector<2x8x8xf32>, vector<2x8x8xf32>, vector<2x8x8xf32> -> vector<8x8x8xf32>
    "tpu.trace_start"() <{level = 10 : i32, message = "bqd,bkd->bqk"}> : () -> ()
    %cst_37 = arith.constant dense<0.000000e+00> : vector<8x8x8xf32>
    %81 = tpu.matmul %78, %79, %cst_37 {dimension_numbers = #tpu.dot_dimension_numbers<[2], [2], [1], [1], [0, 0, 0, 1, 1, 1], [0], [0]>} : vector<8x8x8xf32>, vector<8x8x8xf32>, vector<8x8x8xf32> -> vector<8x8x8xf32>
    "tpu.trace_stop"() : () -> ()
    %cst_38 = arith.constant 0.353553385 : f32
    %82 = vector.broadcast %cst_38 : f32 to vector<8x8x8xf32>
    %83 = arith.mulf %81, %82 : vector<8x8x8xf32>
    %84 = vector.broadcast %17 : vector<1x8x8xf32> to vector<8x8x8xf32>
    %85 = arith.addf %83, %84 : vector<8x8x8xf32>
    %cst_39 = arith.constant dense<0xFF800000> : vector<8x8xf32>
    %86 = vector.multi_reduction <maximumf>, %85, %cst_39 [2] : vector<8x8x8xf32> to vector<8x8xf32>
    %87 = vector.shape_cast %86 : vector<8x8xf32> to vector<8x8x1xf32>
    %88 = vector.broadcast %87 : vector<8x8x1xf32> to vector<8x8x8xf32>
    %89 = arith.subf %85, %88 : vector<8x8x8xf32>
    %90 = math.exp %89 : vector<8x8x8xf32>
    %cst_40 = arith.constant dense<0.000000e+00> : vector<8x8xf32>
    %91 = vector.multi_reduction <add>, %90, %cst_40 [2] : vector<8x8x8xf32> to vector<8x8xf32>
    %92 = vector.shape_cast %91 : vector<8x8xf32> to vector<8x8x1xf32>
    %93 = tpu.reciprocal %92 {approx = true} : vector<8x8x1xf32> -> vector<8x8x1xf32>
    %94 = vector.broadcast %93 : vector<8x8x1xf32> to vector<8x8x8xf32>
    %95 = arith.mulf %90, %94 : vector<8x8x8xf32>
    "tpu.trace_start"() <{level = 10 : i32, message = "bqk,bkd->bqd"}> : () -> ()
    %cst_41 = arith.constant dense<0.000000e+00> : vector<8x8x8xf32>
    %96 = tpu.matmul %95, %80, %cst_41 {dimension_numbers = #tpu.dot_dimension_numbers<[2], [1], [1], [2], [0, 0, 0, 1, 1, 2], [0], [0]>} : vector<8x8x8xf32>, vector<8x8x8xf32>, vector<8x8x8xf32> -> vector<8x8x8xf32>
    "tpu.trace_stop"() : () -> ()
    %97 = vector.extract_strided_slice %96 {offsets = [0, 0, 0], sizes = [2, 8, 8], strides = [1, 1, 1]} : vector<8x8x8xf32> to vector<2x8x8xf32>
    %98 = vector.shape_cast %97 : vector<2x8x8xf32> to vector<16x8xf32>
    %99 = vector.extract_strided_slice %96 {offsets = [2, 0, 0], sizes = [2, 8, 8], strides = [1, 1, 1]} : vector<8x8x8xf32> to vector<2x8x8xf32>
    %100 = vector.shape_cast %99 : vector<2x8x8xf32> to vector<16x8xf32>
    %101 = vector.extract_strided_slice %96 {offsets = [4, 0, 0], sizes = [2, 8, 8], strides = [1, 1, 1]} : vector<8x8x8xf32> to vector<2x8x8xf32>
    %102 = vector.shape_cast %101 : vector<2x8x8xf32> to vector<16x8xf32>
    %103 = vector.extract_strided_slice %96 {offsets = [6, 0, 0], sizes = [2, 8, 8], strides = [1, 1, 1]} : vector<8x8x8xf32> to vector<2x8x8xf32>
    %104 = vector.shape_cast %103 : vector<2x8x8xf32> to vector<16x8xf32>
    %105 = tpu.concatenate %98, %100, %102, %104 in 1 : vector<16x8xf32>, vector<16x8xf32>, vector<16x8xf32>, vector<16x8xf32> -> vector<16x32xf32>
    %c472 = arith.constant 472 : index
    %c0_42 = arith.constant 0 : index
    %106 = vector.load %arg1[%c472, %c0_42] : memref<1392x128xf32, #tpu.memory_space<vmem>>, vector<32x32xf32>
    %cst_43 = arith.constant dense<0.000000e+00> : vector<16x32xf32>
    %107 = tpu.matmul %105, %106, %cst_43 {dimension_numbers = #tpu.dot_dimension_numbers<[1], [0], [0], [1], [0, 0, 1, 1], [], []>} : vector<16x32xf32>, vector<32x32xf32>, vector<16x32xf32> -> vector<16x32xf32>
    %108 = arith.addf %10, %107 : vector<16x32xf32>
    %c504 = arith.constant 504 : index
    %c0_44 = arith.constant 0 : index
    %109 = vector.load %arg1[%c504, %c0_44] : memref<1392x128xf32, #tpu.memory_space<vmem>>, vector<1x32xf32>
    %110 = vector.broadcast %109 : vector<1x32xf32> to vector<16x32xf32>
    %111 = arith.addf %108, %110 : vector<16x32xf32>
    %c512 = arith.constant 512 : index
    %c0_45 = arith.constant 0 : index
    %112 = vector.load %arg1[%c512, %c0_45] : memref<1392x128xf32, #tpu.memory_space<vmem>>, vector<1x32xf32>
    %c520 = arith.constant 520 : index
    %c0_46 = arith.constant 0 : index
    %113 = vector.load %arg1[%c520, %c0_46] : memref<1392x128xf32, #tpu.memory_space<vmem>>, vector<1x32xf32>
    %cst_47 = arith.constant dense<0.000000e+00> : vector<16xf32>
    %114 = vector.multi_reduction <add>, %111, %cst_47 [1] : vector<16x32xf32> to vector<16xf32>
    %115 = vector.shape_cast %114 : vector<16xf32> to vector<16x1xf32>
    %cst_48 = arith.constant 3.200000e+01 : f32
    %116 = vector.broadcast %cst_48 : f32 to vector<16x1xf32>
    %117 = arith.divf %115, %116 : vector<16x1xf32>
    %118 = vector.broadcast %117 : vector<16x1xf32> to vector<16x32xf32>
    %119 = arith.subf %111, %118 : vector<16x32xf32>
    %120 = arith.mulf %119, %119 : vector<16x32xf32>
    %cst_49 = arith.constant dense<0.000000e+00> : vector<16xf32>
    %121 = vector.multi_reduction <add>, %120, %cst_49 [1] : vector<16x32xf32> to vector<16xf32>
    %122 = vector.shape_cast %121 : vector<16xf32> to vector<16x1xf32>
    %cst_50 = arith.constant 3.200000e+01 : f32
    %123 = vector.broadcast %cst_50 : f32 to vector<16x1xf32>
    %124 = arith.divf %122, %123 : vector<16x1xf32>
    %125 = vector.broadcast %117 : vector<16x1xf32> to vector<16x32xf32>
    %126 = arith.subf %111, %125 : vector<16x32xf32>
    %cst_51 = arith.constant 9.99999974E-6 : f32
    %127 = vector.broadcast %cst_51 : f32 to vector<16x1xf32>
    %128 = arith.addf %124, %127 : vector<16x1xf32>
    %129 = math.rsqrt %128 : vector<16x1xf32>
    %130 = vector.broadcast %129 : vector<16x1xf32> to vector<16x32xf32>
    %131 = arith.mulf %126, %130 : vector<16x32xf32>
    %132 = vector.broadcast %112 : vector<1x32xf32> to vector<16x32xf32>
    %133 = arith.mulf %131, %132 : vector<16x32xf32>
    %134 = vector.broadcast %113 : vector<1x32xf32> to vector<16x32xf32>
    %135 = arith.addf %133, %134 : vector<16x32xf32>
    %c528 = arith.constant 528 : index
    %c0_52 = arith.constant 0 : index
    %136 = vector.load %arg1[%c528, %c0_52] : memref<1392x128xf32, #tpu.memory_space<vmem>>, vector<32x128xf32>
    %cst_53 = arith.constant dense<0.000000e+00> : vector<16x128xf32>
    %137 = tpu.matmul %135, %136, %cst_53 {dimension_numbers = #tpu.dot_dimension_numbers<[1], [0], [0], [1], [0, 0, 1, 1], [], []>} : vector<16x32xf32>, vector<32x128xf32>, vector<16x128xf32> -> vector<16x128xf32>
    %c560 = arith.constant 560 : index
    %c0_54 = arith.constant 0 : index
    %138 = vector.load %arg1[%c560, %c0_54] : memref<1392x128xf32, #tpu.memory_space<vmem>>, vector<1x128xf32>
    %139 = vector.broadcast %138 : vector<1x128xf32> to vector<16x128xf32>
    %140 = arith.addf %137, %139 : vector<16x128xf32>
    %cst_55 = arith.constant 0.000000e+00 : f32
    %141 = vector.broadcast %cst_55 : f32 to vector<16x128xf32>
    %142 = arith.maximumf %140, %141 : vector<16x128xf32>
    %c568 = arith.constant 568 : index
    %c0_56 = arith.constant 0 : index
    %143 = vector.load %arg1[%c568, %c0_56] : memref<1392x128xf32, #tpu.memory_space<vmem>>, vector<128x32xf32>
    %cst_57 = arith.constant dense<0.000000e+00> : vector<16x32xf32>
    %144 = tpu.matmul %142, %143, %cst_57 {dimension_numbers = #tpu.dot_dimension_numbers<[1], [0], [0], [1], [0, 0, 1, 1], [], []>} : vector<16x128xf32>, vector<128x32xf32>, vector<16x32xf32> -> vector<16x32xf32>
    %145 = arith.addf %111, %144 : vector<16x32xf32>
    %c696 = arith.constant 696 : index
    %c0_58 = arith.constant 0 : index
    %146 = vector.load %arg1[%c696, %c0_58] : memref<1392x128xf32, #tpu.memory_space<vmem>>, vector<1x32xf32>
    %147 = vector.broadcast %146 : vector<1x32xf32> to vector<16x32xf32>
    %148 = arith.addf %145, %147 : vector<16x32xf32>
    %c704 = arith.constant 704 : index
    %c0_59 = arith.constant 0 : index
    %149 = vector.load %arg1[%c704, %c0_59] : memref<1392x128xf32, #tpu.memory_space<vmem>>, vector<1x32xf32>
    %c712 = arith.constant 712 : index
    %c0_60 = arith.constant 0 : index
    %150 = vector.load %arg1[%c712, %c0_60] : memref<1392x128xf32, #tpu.memory_space<vmem>>, vector<1x32xf32>
    %cst_61 = arith.constant dense<0.000000e+00> : vector<16xf32>
    %151 = vector.multi_reduction <add>, %148, %cst_61 [1] : vector<16x32xf32> to vector<16xf32>
    %152 = vector.shape_cast %151 : vector<16xf32> to vector<16x1xf32>
    %cst_62 = arith.constant 3.200000e+01 : f32
    %153 = vector.broadcast %cst_62 : f32 to vector<16x1xf32>
    %154 = arith.divf %152, %153 : vector<16x1xf32>
    %155 = vector.broadcast %154 : vector<16x1xf32> to vector<16x32xf32>
    %156 = arith.subf %148, %155 : vector<16x32xf32>
    %157 = arith.mulf %156, %156 : vector<16x32xf32>
    %cst_63 = arith.constant dense<0.000000e+00> : vector<16xf32>
    %158 = vector.multi_reduction <add>, %157, %cst_63 [1] : vector<16x32xf32> to vector<16xf32>
    %159 = vector.shape_cast %158 : vector<16xf32> to vector<16x1xf32>
    %cst_64 = arith.constant 3.200000e+01 : f32
    %160 = vector.broadcast %cst_64 : f32 to vector<16x1xf32>
    %161 = arith.divf %159, %160 : vector<16x1xf32>
    %162 = vector.broadcast %154 : vector<16x1xf32> to vector<16x32xf32>
    %163 = arith.subf %148, %162 : vector<16x32xf32>
    %cst_65 = arith.constant 9.99999974E-6 : f32
    %164 = vector.broadcast %cst_65 : f32 to vector<16x1xf32>
    %165 = arith.addf %161, %164 : vector<16x1xf32>
    %166 = math.rsqrt %165 : vector<16x1xf32>
    %167 = vector.broadcast %166 : vector<16x1xf32> to vector<16x32xf32>
    %168 = arith.mulf %163, %167 : vector<16x32xf32>
    %169 = vector.broadcast %149 : vector<1x32xf32> to vector<16x32xf32>
    %170 = arith.mulf %168, %169 : vector<16x32xf32>
    %171 = vector.broadcast %150 : vector<1x32xf32> to vector<16x32xf32>
    %172 = arith.addf %170, %171 : vector<16x32xf32>
    %c720 = arith.constant 720 : index
    %c0_66 = arith.constant 0 : index
    %173 = vector.load %arg1[%c720, %c0_66] : memref<1392x128xf32, #tpu.memory_space<vmem>>, vector<32x8xf32>
    %cst_67 = arith.constant dense<0.000000e+00> : vector<16x8xf32>
    %174 = tpu.matmul %172, %173, %cst_67 {dimension_numbers = #tpu.dot_dimension_numbers<[1], [0], [0], [1], [0, 0, 1, 1], [], []>} : vector<16x32xf32>, vector<32x8xf32>, vector<16x8xf32> -> vector<16x8xf32>
    %175 = vector.shape_cast %174 : vector<16x8xf32> to vector<2x8x8xf32>
    %c752 = arith.constant 752 : index
    %c0_68 = arith.constant 0 : index
    %176 = vector.load %arg1[%c752, %c0_68] : memref<1392x128xf32, #tpu.memory_space<vmem>>, vector<32x8xf32>
    %cst_69 = arith.constant dense<0.000000e+00> : vector<16x8xf32>
    %177 = tpu.matmul %172, %176, %cst_69 {dimension_numbers = #tpu.dot_dimension_numbers<[1], [0], [0], [1], [0, 0, 1, 1], [], []>} : vector<16x32xf32>, vector<32x8xf32>, vector<16x8xf32> -> vector<16x8xf32>
    %178 = vector.shape_cast %177 : vector<16x8xf32> to vector<2x8x8xf32>
    %c784 = arith.constant 784 : index
    %c0_70 = arith.constant 0 : index
    %179 = vector.load %arg1[%c784, %c0_70] : memref<1392x128xf32, #tpu.memory_space<vmem>>, vector<32x8xf32>
    %cst_71 = arith.constant dense<0.000000e+00> : vector<16x8xf32>
    %180 = tpu.matmul %172, %179, %cst_71 {dimension_numbers = #tpu.dot_dimension_numbers<[1], [0], [0], [1], [0, 0, 1, 1], [], []>} : vector<16x32xf32>, vector<32x8xf32>, vector<16x8xf32> -> vector<16x8xf32>
    %181 = vector.shape_cast %180 : vector<16x8xf32> to vector<2x8x8xf32>
    %c816 = arith.constant 816 : index
    %c0_72 = arith.constant 0 : index
    %182 = vector.load %arg1[%c816, %c0_72] : memref<1392x128xf32, #tpu.memory_space<vmem>>, vector<32x8xf32>
    %cst_73 = arith.constant dense<0.000000e+00> : vector<16x8xf32>
    %183 = tpu.matmul %172, %182, %cst_73 {dimension_numbers = #tpu.dot_dimension_numbers<[1], [0], [0], [1], [0, 0, 1, 1], [], []>} : vector<16x32xf32>, vector<32x8xf32>, vector<16x8xf32> -> vector<16x8xf32>
    %184 = vector.shape_cast %183 : vector<16x8xf32> to vector<2x8x8xf32>
    %c848 = arith.constant 848 : index
    %c0_74 = arith.constant 0 : index
    %185 = vector.load %arg1[%c848, %c0_74] : memref<1392x128xf32, #tpu.memory_space<vmem>>, vector<32x8xf32>
    %cst_75 = arith.constant dense<0.000000e+00> : vector<16x8xf32>
    %186 = tpu.matmul %172, %185, %cst_75 {dimension_numbers = #tpu.dot_dimension_numbers<[1], [0], [0], [1], [0, 0, 1, 1], [], []>} : vector<16x32xf32>, vector<32x8xf32>, vector<16x8xf32> -> vector<16x8xf32>
    %187 = vector.shape_cast %186 : vector<16x8xf32> to vector<2x8x8xf32>
    %c880 = arith.constant 880 : index
    %c0_76 = arith.constant 0 : index
    %188 = vector.load %arg1[%c880, %c0_76] : memref<1392x128xf32, #tpu.memory_space<vmem>>, vector<32x8xf32>
    %cst_77 = arith.constant dense<0.000000e+00> : vector<16x8xf32>
    %189 = tpu.matmul %172, %188, %cst_77 {dimension_numbers = #tpu.dot_dimension_numbers<[1], [0], [0], [1], [0, 0, 1, 1], [], []>} : vector<16x32xf32>, vector<32x8xf32>, vector<16x8xf32> -> vector<16x8xf32>
    %190 = vector.shape_cast %189 : vector<16x8xf32> to vector<2x8x8xf32>
    %c912 = arith.constant 912 : index
    %c0_78 = arith.constant 0 : index
    %191 = vector.load %arg1[%c912, %c0_78] : memref<1392x128xf32, #tpu.memory_space<vmem>>, vector<32x8xf32>
    %cst_79 = arith.constant dense<0.000000e+00> : vector<16x8xf32>
    %192 = tpu.matmul %172, %191, %cst_79 {dimension_numbers = #tpu.dot_dimension_numbers<[1], [0], [0], [1], [0, 0, 1, 1], [], []>} : vector<16x32xf32>, vector<32x8xf32>, vector<16x8xf32> -> vector<16x8xf32>
    %193 = vector.shape_cast %192 : vector<16x8xf32> to vector<2x8x8xf32>
    %c944 = arith.constant 944 : index
    %c0_80 = arith.constant 0 : index
    %194 = vector.load %arg1[%c944, %c0_80] : memref<1392x128xf32, #tpu.memory_space<vmem>>, vector<32x8xf32>
    %cst_81 = arith.constant dense<0.000000e+00> : vector<16x8xf32>
    %195 = tpu.matmul %172, %194, %cst_81 {dimension_numbers = #tpu.dot_dimension_numbers<[1], [0], [0], [1], [0, 0, 1, 1], [], []>} : vector<16x32xf32>, vector<32x8xf32>, vector<16x8xf32> -> vector<16x8xf32>
    %196 = vector.shape_cast %195 : vector<16x8xf32> to vector<2x8x8xf32>
    %c976 = arith.constant 976 : index
    %c0_82 = arith.constant 0 : index
    %197 = vector.load %arg1[%c976, %c0_82] : memref<1392x128xf32, #tpu.memory_space<vmem>>, vector<32x8xf32>
    %cst_83 = arith.constant dense<0.000000e+00> : vector<16x8xf32>
    %198 = tpu.matmul %172, %197, %cst_83 {dimension_numbers = #tpu.dot_dimension_numbers<[1], [0], [0], [1], [0, 0, 1, 1], [], []>} : vector<16x32xf32>, vector<32x8xf32>, vector<16x8xf32> -> vector<16x8xf32>
    %199 = vector.shape_cast %198 : vector<16x8xf32> to vector<2x8x8xf32>
    %c1008 = arith.constant 1008 : index
    %c0_84 = arith.constant 0 : index
    %200 = vector.load %arg1[%c1008, %c0_84] : memref<1392x128xf32, #tpu.memory_space<vmem>>, vector<32x8xf32>
    %cst_85 = arith.constant dense<0.000000e+00> : vector<16x8xf32>
    %201 = tpu.matmul %172, %200, %cst_85 {dimension_numbers = #tpu.dot_dimension_numbers<[1], [0], [0], [1], [0, 0, 1, 1], [], []>} : vector<16x32xf32>, vector<32x8xf32>, vector<16x8xf32> -> vector<16x8xf32>
    %202 = vector.shape_cast %201 : vector<16x8xf32> to vector<2x8x8xf32>
    %c1040 = arith.constant 1040 : index
    %c0_86 = arith.constant 0 : index
    %203 = vector.load %arg1[%c1040, %c0_86] : memref<1392x128xf32, #tpu.memory_space<vmem>>, vector<32x8xf32>
    %cst_87 = arith.constant dense<0.000000e+00> : vector<16x8xf32>
    %204 = tpu.matmul %172, %203, %cst_87 {dimension_numbers = #tpu.dot_dimension_numbers<[1], [0], [0], [1], [0, 0, 1, 1], [], []>} : vector<16x32xf32>, vector<32x8xf32>, vector<16x8xf32> -> vector<16x8xf32>
    %205 = vector.shape_cast %204 : vector<16x8xf32> to vector<2x8x8xf32>
    %c1072 = arith.constant 1072 : index
    %c0_88 = arith.constant 0 : index
    %206 = vector.load %arg1[%c1072, %c0_88] : memref<1392x128xf32, #tpu.memory_space<vmem>>, vector<32x8xf32>
    %cst_89 = arith.constant dense<0.000000e+00> : vector<16x8xf32>
    %207 = tpu.matmul %172, %206, %cst_89 {dimension_numbers = #tpu.dot_dimension_numbers<[1], [0], [0], [1], [0, 0, 1, 1], [], []>} : vector<16x32xf32>, vector<32x8xf32>, vector<16x8xf32> -> vector<16x8xf32>
    %208 = vector.shape_cast %207 : vector<16x8xf32> to vector<2x8x8xf32>
    %209 = tpu.concatenate %175, %184, %193, %202 in 0 : vector<2x8x8xf32>, vector<2x8x8xf32>, vector<2x8x8xf32>, vector<2x8x8xf32> -> vector<8x8x8xf32>
    %210 = tpu.concatenate %178, %187, %196, %205 in 0 : vector<2x8x8xf32>, vector<2x8x8xf32>, vector<2x8x8xf32>, vector<2x8x8xf32> -> vector<8x8x8xf32>
    %211 = tpu.concatenate %181, %190, %199, %208 in 0 : vector<2x8x8xf32>, vector<2x8x8xf32>, vector<2x8x8xf32>, vector<2x8x8xf32> -> vector<8x8x8xf32>
    "tpu.trace_start"() <{level = 10 : i32, message = "bqd,bkd->bqk"}> : () -> ()
    %cst_90 = arith.constant dense<0.000000e+00> : vector<8x8x8xf32>
    %212 = tpu.matmul %209, %210, %cst_90 {dimension_numbers = #tpu.dot_dimension_numbers<[2], [2], [1], [1], [0, 0, 0, 1, 1, 1], [0], [0]>} : vector<8x8x8xf32>, vector<8x8x8xf32>, vector<8x8x8xf32> -> vector<8x8x8xf32>
    "tpu.trace_stop"() : () -> ()
    %cst_91 = arith.constant 0.353553385 : f32
    %213 = vector.broadcast %cst_91 : f32 to vector<8x8x8xf32>
    %214 = arith.mulf %212, %213 : vector<8x8x8xf32>
    %215 = vector.broadcast %17 : vector<1x8x8xf32> to vector<8x8x8xf32>
    %216 = arith.addf %214, %215 : vector<8x8x8xf32>
    %cst_92 = arith.constant dense<0xFF800000> : vector<8x8xf32>
    %217 = vector.multi_reduction <maximumf>, %216, %cst_92 [2] : vector<8x8x8xf32> to vector<8x8xf32>
    %218 = vector.shape_cast %217 : vector<8x8xf32> to vector<8x8x1xf32>
    %219 = vector.broadcast %218 : vector<8x8x1xf32> to vector<8x8x8xf32>
    %220 = arith.subf %216, %219 : vector<8x8x8xf32>
    %221 = math.exp %220 : vector<8x8x8xf32>
    %cst_93 = arith.constant dense<0.000000e+00> : vector<8x8xf32>
    %222 = vector.multi_reduction <add>, %221, %cst_93 [2] : vector<8x8x8xf32> to vector<8x8xf32>
    %223 = vector.shape_cast %222 : vector<8x8xf32> to vector<8x8x1xf32>
    %224 = tpu.reciprocal %223 {approx = true} : vector<8x8x1xf32> -> vector<8x8x1xf32>
    %225 = vector.broadcast %224 : vector<8x8x1xf32> to vector<8x8x8xf32>
    %226 = arith.mulf %221, %225 : vector<8x8x8xf32>
    "tpu.trace_start"() <{level = 10 : i32, message = "bqk,bkd->bqd"}> : () -> ()
    %cst_94 = arith.constant dense<0.000000e+00> : vector<8x8x8xf32>
    %227 = tpu.matmul %226, %211, %cst_94 {dimension_numbers = #tpu.dot_dimension_numbers<[2], [1], [1], [2], [0, 0, 0, 1, 1, 2], [0], [0]>} : vector<8x8x8xf32>, vector<8x8x8xf32>, vector<8x8x8xf32> -> vector<8x8x8xf32>
    "tpu.trace_stop"() : () -> ()
    %228 = vector.extract_strided_slice %227 {offsets = [0, 0, 0], sizes = [2, 8, 8], strides = [1, 1, 1]} : vector<8x8x8xf32> to vector<2x8x8xf32>
    %229 = vector.shape_cast %228 : vector<2x8x8xf32> to vector<16x8xf32>
    %230 = vector.extract_strided_slice %227 {offsets = [2, 0, 0], sizes = [2, 8, 8], strides = [1, 1, 1]} : vector<8x8x8xf32> to vector<2x8x8xf32>
    %231 = vector.shape_cast %230 : vector<2x8x8xf32> to vector<16x8xf32>
    %232 = vector.extract_strided_slice %227 {offsets = [4, 0, 0], sizes = [2, 8, 8], strides = [1, 1, 1]} : vector<8x8x8xf32> to vector<2x8x8xf32>
    %233 = vector.shape_cast %232 : vector<2x8x8xf32> to vector<16x8xf32>
    %234 = vector.extract_strided_slice %227 {offsets = [6, 0, 0], sizes = [2, 8, 8], strides = [1, 1, 1]} : vector<8x8x8xf32> to vector<2x8x8xf32>
    %235 = vector.shape_cast %234 : vector<2x8x8xf32> to vector<16x8xf32>
    %236 = tpu.concatenate %229, %231, %233, %235 in 1 : vector<16x8xf32>, vector<16x8xf32>, vector<16x8xf32>, vector<16x8xf32> -> vector<16x32xf32>
    %c1104 = arith.constant 1104 : index
    %c0_95 = arith.constant 0 : index
    %237 = vector.load %arg1[%c1104, %c0_95] : memref<1392x128xf32, #tpu.memory_space<vmem>>, vector<32x32xf32>
    %cst_96 = arith.constant dense<0.000000e+00> : vector<16x32xf32>
    %238 = tpu.matmul %236, %237, %cst_96 {dimension_numbers = #tpu.dot_dimension_numbers<[1], [0], [0], [1], [0, 0, 1, 1], [], []>} : vector<16x32xf32>, vector<32x32xf32>, vector<16x32xf32> -> vector<16x32xf32>
    %239 = arith.addf %148, %238 : vector<16x32xf32>
    %c1136 = arith.constant 1136 : index
    %c0_97 = arith.constant 0 : index
    %240 = vector.load %arg1[%c1136, %c0_97] : memref<1392x128xf32, #tpu.memory_space<vmem>>, vector<1x32xf32>
    %241 = vector.broadcast %240 : vector<1x32xf32> to vector<16x32xf32>
    %242 = arith.addf %239, %241 : vector<16x32xf32>
    %c1144 = arith.constant 1144 : index
    %c0_98 = arith.constant 0 : index
    %243 = vector.load %arg1[%c1144, %c0_98] : memref<1392x128xf32, #tpu.memory_space<vmem>>, vector<1x32xf32>
    %c1152 = arith.constant 1152 : index
    %c0_99 = arith.constant 0 : index
    %244 = vector.load %arg1[%c1152, %c0_99] : memref<1392x128xf32, #tpu.memory_space<vmem>>, vector<1x32xf32>
    %cst_100 = arith.constant dense<0.000000e+00> : vector<16xf32>
    %245 = vector.multi_reduction <add>, %242, %cst_100 [1] : vector<16x32xf32> to vector<16xf32>
    %246 = vector.shape_cast %245 : vector<16xf32> to vector<16x1xf32>
    %cst_101 = arith.constant 3.200000e+01 : f32
    %247 = vector.broadcast %cst_101 : f32 to vector<16x1xf32>
    %248 = arith.divf %246, %247 : vector<16x1xf32>
    %249 = vector.broadcast %248 : vector<16x1xf32> to vector<16x32xf32>
    %250 = arith.subf %242, %249 : vector<16x32xf32>
    %251 = arith.mulf %250, %250 : vector<16x32xf32>
    %cst_102 = arith.constant dense<0.000000e+00> : vector<16xf32>
    %252 = vector.multi_reduction <add>, %251, %cst_102 [1] : vector<16x32xf32> to vector<16xf32>
    %253 = vector.shape_cast %252 : vector<16xf32> to vector<16x1xf32>
    %cst_103 = arith.constant 3.200000e+01 : f32
    %254 = vector.broadcast %cst_103 : f32 to vector<16x1xf32>
    %255 = arith.divf %253, %254 : vector<16x1xf32>
    %256 = vector.broadcast %248 : vector<16x1xf32> to vector<16x32xf32>
    %257 = arith.subf %242, %256 : vector<16x32xf32>
    %cst_104 = arith.constant 9.99999974E-6 : f32
    %258 = vector.broadcast %cst_104 : f32 to vector<16x1xf32>
    %259 = arith.addf %255, %258 : vector<16x1xf32>
    %260 = math.rsqrt %259 : vector<16x1xf32>
    %261 = vector.broadcast %260 : vector<16x1xf32> to vector<16x32xf32>
    %262 = arith.mulf %257, %261 : vector<16x32xf32>
    %263 = vector.broadcast %243 : vector<1x32xf32> to vector<16x32xf32>
    %264 = arith.mulf %262, %263 : vector<16x32xf32>
    %265 = vector.broadcast %244 : vector<1x32xf32> to vector<16x32xf32>
    %266 = arith.addf %264, %265 : vector<16x32xf32>
    %c1160 = arith.constant 1160 : index
    %c0_105 = arith.constant 0 : index
    %267 = vector.load %arg1[%c1160, %c0_105] : memref<1392x128xf32, #tpu.memory_space<vmem>>, vector<32x128xf32>
    %cst_106 = arith.constant dense<0.000000e+00> : vector<16x128xf32>
    %268 = tpu.matmul %266, %267, %cst_106 {dimension_numbers = #tpu.dot_dimension_numbers<[1], [0], [0], [1], [0, 0, 1, 1], [], []>} : vector<16x32xf32>, vector<32x128xf32>, vector<16x128xf32> -> vector<16x128xf32>
    %c1192 = arith.constant 1192 : index
    %c0_107 = arith.constant 0 : index
    %269 = vector.load %arg1[%c1192, %c0_107] : memref<1392x128xf32, #tpu.memory_space<vmem>>, vector<1x128xf32>
    %270 = vector.broadcast %269 : vector<1x128xf32> to vector<16x128xf32>
    %271 = arith.addf %268, %270 : vector<16x128xf32>
    %cst_108 = arith.constant 0.000000e+00 : f32
    %272 = vector.broadcast %cst_108 : f32 to vector<16x128xf32>
    %273 = arith.maximumf %271, %272 : vector<16x128xf32>
    %c1200 = arith.constant 1200 : index
    %c0_109 = arith.constant 0 : index
    %274 = vector.load %arg1[%c1200, %c0_109] : memref<1392x128xf32, #tpu.memory_space<vmem>>, vector<128x32xf32>
    %cst_110 = arith.constant dense<0.000000e+00> : vector<16x32xf32>
    %275 = tpu.matmul %273, %274, %cst_110 {dimension_numbers = #tpu.dot_dimension_numbers<[1], [0], [0], [1], [0, 0, 1, 1], [], []>} : vector<16x128xf32>, vector<128x32xf32>, vector<16x32xf32> -> vector<16x32xf32>
    %276 = arith.addf %242, %275 : vector<16x32xf32>
    %c1328 = arith.constant 1328 : index
    %c0_111 = arith.constant 0 : index
    %277 = vector.load %arg1[%c1328, %c0_111] : memref<1392x128xf32, #tpu.memory_space<vmem>>, vector<1x32xf32>
    %278 = vector.broadcast %277 : vector<1x32xf32> to vector<16x32xf32>
    %279 = arith.addf %276, %278 : vector<16x32xf32>
    %c1336 = arith.constant 1336 : index
    %c0_112 = arith.constant 0 : index
    %280 = vector.load %arg1[%c1336, %c0_112] : memref<1392x128xf32, #tpu.memory_space<vmem>>, vector<1x32xf32>
    %c1344 = arith.constant 1344 : index
    %c0_113 = arith.constant 0 : index
    %281 = vector.load %arg1[%c1344, %c0_113] : memref<1392x128xf32, #tpu.memory_space<vmem>>, vector<1x32xf32>
    %cst_114 = arith.constant dense<0.000000e+00> : vector<16xf32>
    %282 = vector.multi_reduction <add>, %279, %cst_114 [1] : vector<16x32xf32> to vector<16xf32>
    %283 = vector.shape_cast %282 : vector<16xf32> to vector<16x1xf32>
    %cst_115 = arith.constant 3.200000e+01 : f32
    %284 = vector.broadcast %cst_115 : f32 to vector<16x1xf32>
    %285 = arith.divf %283, %284 : vector<16x1xf32>
    %286 = vector.broadcast %285 : vector<16x1xf32> to vector<16x32xf32>
    %287 = arith.subf %279, %286 : vector<16x32xf32>
    %288 = arith.mulf %287, %287 : vector<16x32xf32>
    %cst_116 = arith.constant dense<0.000000e+00> : vector<16xf32>
    %289 = vector.multi_reduction <add>, %288, %cst_116 [1] : vector<16x32xf32> to vector<16xf32>
    %290 = vector.shape_cast %289 : vector<16xf32> to vector<16x1xf32>
    %cst_117 = arith.constant 3.200000e+01 : f32
    %291 = vector.broadcast %cst_117 : f32 to vector<16x1xf32>
    %292 = arith.divf %290, %291 : vector<16x1xf32>
    %293 = vector.broadcast %285 : vector<16x1xf32> to vector<16x32xf32>
    %294 = arith.subf %279, %293 : vector<16x32xf32>
    %cst_118 = arith.constant 9.99999974E-6 : f32
    %295 = vector.broadcast %cst_118 : f32 to vector<16x1xf32>
    %296 = arith.addf %292, %295 : vector<16x1xf32>
    %297 = math.rsqrt %296 : vector<16x1xf32>
    %298 = vector.broadcast %297 : vector<16x1xf32> to vector<16x32xf32>
    %299 = arith.mulf %294, %298 : vector<16x32xf32>
    %300 = vector.broadcast %280 : vector<1x32xf32> to vector<16x32xf32>
    %301 = arith.mulf %299, %300 : vector<16x32xf32>
    %302 = vector.broadcast %281 : vector<1x32xf32> to vector<16x32xf32>
    %303 = arith.addf %301, %302 : vector<16x32xf32>
    %c1352 = arith.constant 1352 : index
    %c0_119 = arith.constant 0 : index
    %304 = vector.load %arg1[%c1352, %c0_119] : memref<1392x128xf32, #tpu.memory_space<vmem>>, vector<32x128xf32>
    %cst_120 = arith.constant dense<0.000000e+00> : vector<16x128xf32>
    %305 = tpu.matmul %303, %304, %cst_120 {dimension_numbers = #tpu.dot_dimension_numbers<[1], [0], [0], [1], [0, 0, 1, 1], [], []>} : vector<16x32xf32>, vector<32x128xf32>, vector<16x128xf32> -> vector<16x128xf32>
    %c1384 = arith.constant 1384 : index
    %c0_121 = arith.constant 0 : index
    %306 = vector.load %arg1[%c1384, %c0_121] : memref<1392x128xf32, #tpu.memory_space<vmem>>, vector<1x128xf32>
    %307 = vector.broadcast %306 : vector<1x128xf32> to vector<16x128xf32>
    %308 = arith.addf %305, %307 : vector<16x128xf32>
    %c0_122 = arith.constant 0 : index
    %c0_123 = arith.constant 0 : index
    %309 = vector.load %arg2[%c0_122, %c0_123] : memref<16x128xf32, #tpu.memory_space<vmem>>, vector<16x128xf32>
    tpu.vector_store %arg2[%c0_122, %c0_123], %308 {strides = array<i32>} : memref<16x128xf32, #tpu.memory_space<vmem>>, vector<16x128xf32>,
    return
  }
}

</mosaic_0001>

<bundles_post_ra>
// kernel: decoder_forward.1
= control target key start
LH: loop header
LB: loop body
LE: loop exit
PB: predicated region body
PF: predicated region fallthrough
CT: control target
= control target key end

     0   :  { %7 = vsyncpa [#allocation3], 0  ;;  %s6979_s9 = smov [#allocation2]   ;;  %s7475_s0 = inlined_call_operand.vmem [shape: s32[16,1], index: 0, kind: input, shape index: {}]   ;;  %s7476_s1 = inlined_call_operand.hbm [shape: f32[1392,128], index: 1, kind: input, shape index: {}]   ;;  %s7477_s2 = inlined_call_operand.vmem [shape: f32[16,128], index: 2, kind: output, shape index: {}]  }
   0x1   :  { %s15_s10 = sshll.u32 %s6979_s9, 4  ;;  %s6955_s13 = scalar_lea.hbm %s7476_s1, 22272  ;;  %s16_s10 = int_to_ptr.vmem [resolvable:$true] %s15_s10 }
   0x2   :  { %p6956_p0 = scmp.ne.s32.totalorder %s7476_s1, %s6955_s13  ;;  %p6959_p1 = scmp.lt.u32.totalorder %s6955_s13, %s7476_s1 }
   0x4   :  { %p6961_p2 = pnand %p6959_p1, %p6956_p0 }
   0x6   :  { %6964 = shalt.err (!%p6961_p2)
}
   0x7   :  { %s6965_s18 = scalar_lea.vmem %s16_s10, 22272  ;;  %p6970_p4 = scmp.lt.s32.totalorder %s16_s10, %s16_s10 }
   0x8   :  { %p6966_p3 = scmp.ne.s32.totalorder %s16_s10, %s6965_s18  ;;  %p6971_p5 = scmp.lt.s32.totalorder %s6965_s18, %s6965_s18 }
   0xa   :  { %p6972_p6 = por %p6971_p5, %p6970_p4 }
   0xc   :  { %p6973_p7 = pnand %p6972_p6, %p6966_p3 }
   0xe   :  { %6976 = shalt.err (!%p6973_p7)
}
   0xf   :  { %s6980_s19 = smov 128   ;;  %s6981_s20 = smov 8  }
  0x10   :  { %21 = dma.hbm_to_vmem [thread:$0]  %s7476_s1, 22272, %s16_s10, [#allocation3], %s6980_s19, %s6980_s19, %s6981_s20  }
  0x11   :  { %6977 = dma.done.wait [#allocation3], 22272  }
  0x12   :  { %6978 = vsyncadd [#allocation3], 4294945024  ;;  %v6982_v0 = vmov 0   ;;  %v25_v1 = vld [vmem:[%s7475_s0] sm:$0xff]  ;;  %v42_v3 = vld [vmem:[#allocation2 + $0x8] sm:$0xff]  ;;  %v27_v15 = vlaneseq  ;;  %vm50_vm0 = vcmask 523264  }
  0x13   :  { %6870 = vset.pattern.permute.xlu0 %v6982_v0  ;;  %v41_v2 = vld [vmem:[#allocation2] sm:$0xff]  ;;  %v43_v4 = vld [vmem:[#allocation2 + $0x10] sm:$0xff]  ;;  %v44_v5 = vld [vmem:[#allocation2 + $0x18] sm:$0xff]  ;;  %v6983_v18 = vmov 0.0   ;;  %vm138_vm3 = vcmask 261120   ;;  %vm6984_vm4 = vmmov 0  }
  0x14   :  { %30 = vperm.xlu0 %6870, %v25_v1   ;;  %v26_v6 = vld [vmem:[%s7475_s0 + $0x8] sm:$0xff]  ;;  %v6549_v7 = vpack.c.bf16 %v42_v3, %v41_v2  ;;  %v6553_v8 = vpack.c.bf16 %v44_v5, %v43_v4  ;;  %v45_v9 = vld [vmem:[#allocation2 + $0x20] sm:$0xff]  ;;  %v47_v12 = vld [vmem:[#allocation2 + $0x30] sm:$0xff]  ;;  %v7023_v16 = vand.u32 127, %v27_v15  ;;  %vm1132_vm5 = vcmask 64512   ;;  %s6986_s0 = smov 16  }
  0x15   :  { %v46_v10 = vld [vmem:[#allocation2 + $0x28] sm:$0xff]  ;;  %v48_v13 = vld [vmem:[#allocation2 + $0x38] sm:$0xff]  ;;  %v49_v22 = vld [vmem:[#allocation2 + $0x40] sm:$0xff]  ;;  %s6987_s1 = smov 24   ;;  %vm2455_vm7 = vcmask 130048   ;;  %vm2458_vm8 = vcmask 195584  }
  0x16   :  { %6550 = vmatprep.subr.bf16.mxu1 %v6549_v7  ;;  %v6557_v11 = vpack.c.bf16 %v46_v10, %v45_v9  ;;  %v6561_v14 = vpack.c.bf16 %v48_v13, %v47_v12  ;;  %v178_v39 = vld [vmem:[#allocation2 + $0x58] sm:$0xff]  ;;  %v179_v40 = vld [vmem:[#allocation2 + $0x60] sm:$0xff]  ;;  %v180_v45 = vld [vmem:[#allocation2 + $0x68] sm:$0xff] }
  0x17   :  { %6552 = vmatpush3.bf16.msra.mxu1 %v6549_v7  ;;  %v342_v41 = vld [vmem:[#allocation2 + $0x98] sm:$0xff]  ;;  %v6565_v42 = vpack.c.bf16 %v179_v40, %v178_v39  ;;  %v343_v43 = vld [vmem:[#allocation2 + $0xa0] sm:$0xff]  ;;  %v181_v46 = vld [vmem:[#allocation2 + $0x70] sm:$0xff] }
  0x18   :  { %33 = vperm.xlu0 %6870, %v26_v6   ;;  %6554 = vmatprep.subr.bf16.mxu1 %v6553_v8  ;;  %v6581_v44 = vpack.c.bf16 %v343_v43, %v342_v41  ;;  %v344_v47 = vld [vmem:[#allocation2 + $0xa8] sm:$0xff]  ;;  %v6569_v48 = vpack.c.bf16 %v181_v46, %v180_v45  ;;  %v345_v49 = vld [vmem:[#allocation2 + $0xb0] sm:$0xff]  ;;  %v263_v51 = vld [vmem:[#allocation2 + $0x78] sm:$0xff] }
  0x19   :  { %v6585_v50 = vpack.c.bf16 %v345_v49, %v344_v47  ;;  %v264_v52 = vld [vmem:[#allocation2 + $0x80] sm:$0xff]  ;;  %v500_v53 = vld [vmem:[#allocation2 + $0xd8] sm:$0xff]  ;;  %v5574_v0 = vld [vmem:[#allocation2 + $0x48] ss:$0 sm:$0xff] }
  0x1a   :  { %6582 = vmatprep.subr.bf16.mxu0 %v6581_v44  ;;  %v6573_v54 = vpack.c.bf16 %v264_v52, %v263_v51  ;;  %v501_v55 = vld [vmem:[#allocation2 + $0xe0] sm:$0xff]  ;;  %v5575_v2 = vld [vmem:[#allocation2 + $0x50] ss:$0 sm:$0xff]  ;;  %v265_v7 = vld [vmem:[#allocation2 + $0x88] sm:$0xff] }
  0x1b   :  { %6556 = vmatpush3.bf16.msra.mxu1 %v6553_v8  ;;  %6584 = vmatpush3.bf16.msra.mxu0 %v6581_v44  ;;  %v6597_v56 = vpack.c.bf16 %v501_v55, %v500_v53  ;;  %v266_v9 = vld [vmem:[#allocation2 + $0x90] sm:$0xff]  ;;  %v502_v10 = vld [vmem:[#allocation2 + $0xe8] sm:$0xff]  ;;  %v421_v13 = vld [vmem:[#allocation2 + $0xb8] sm:$0xff] }
  0x1c   :  { %6558 = vmatprep.subr.bf16.mxu1 %v6557_v11  ;;  %6586 = vmatprep.subr.bf16.mxu0 %v6585_v50  ;;  %v582_v39 = vld [vmem:[#allocation2 + $0x110] sm:$0xff]  ;;  %v818_v40 = vld [vmem:[#allocation2 + $0x168] sm:$0xff]  ;;  %v737_v43 = vld [vmem:[#allocation2 + $0x138] sm:$0xff] }
  0x1d   :  { %v819_v41 = vld [vmem:[#allocation2 + $0x170] sm:$0xff]  ;;  %v738_v44 = vld [vmem:[#allocation2 + $0x140] sm:$0xff]  ;;  %v974_v46 = vld [vmem:[#allocation2 + $0x198] sm:$0xff] }
  0x1e   :  { %v6633_v45 = vpack.c.bf16 %v819_v41, %v818_v40  ;;  %v975_v47 = vld [vmem:[#allocation2 + $0x1a0] sm:$0xff]  ;;  %v740_v51 = vld [vmem:[#allocation2 + $0x150] sm:$0xff]  ;;  %v976_v52 = vld [vmem:[#allocation2 + $0x1a8] sm:$0xff] }
  0x1f   :  { %6560 = vmatpush3.bf16.msra.mxu1 %v6557_v11  ;;  %6588 = vmatpush3.bf16.msra.mxu0 %v6585_v50  ;;  %v503_v11 = vld [vmem:[#allocation2 + $0xf0] sm:$0xff]  ;;  %v6645_v49 = vpack.c.bf16 %v975_v47, %v974_v46  ;;  %v739_v50 = vld [vmem:[#allocation2 + $0x148] sm:$0xff]  ;;  %v895_v55 = vld [vmem:[#allocation2 + $0x178] sm:$0xff] }
  0x20   :  { %6562 = vmatprep.subr.bf16.mxu1 %v6561_v14  ;;  %6598 = vmatprep.subr.bf16.mxu0 %v6597_v56  ;;  %v977_v53 = vld [vmem:[#allocation2 + $0x1b0] sm:$0xff] }
  0x23   :  { %6564 = vmatpush3.bf16.msra.mxu1 %v6561_v14  ;;  %v6577_v14 = vpack.c.bf16 %v266_v9, %v265_v7 }
  0x24   :  { %6566 = vmatprep.subr.bf16.mxu1 %v6565_v42 }
  0x93   :  { %v31_v17 = vpop.permute.xlu0 %30 }
  0x94   :  { %vm35_vm1 = vcmp.eq.s32.totalorder %v31_v17, %v7023_v16  ;;  %v6601_v17 = vpack.c.bf16 %v503_v11, %v502_v10 }
  0x95   :  { %v5570_v19 = vsel %vm35_vm1, 1.0, %v6983_v18 }
  0x96   :  { %5997 = vmatprep.mubr.msk.f32.mxu1 %vm50_vm0, %v5570_v19  ;;  %v422_v19 = vld [vmem:[#allocation2 + $0xc0] sm:$0xff] }
  0x97   :  { %v34_v20 = vpop.permute.xlu0 %33 }
  0x98   :  { %vm36_vm2 = vcmp.eq.s32.totalorder %v34_v20, %v7023_v16  ;;  %v658_v20 = vld [vmem:[#allocation2 + $0x118] sm:$0xff] }
  0x99   :  { %v5571_v21 = vsel %vm36_vm2, 1.0, %v6983_v18 }
  0x9a   :  { %5998 = vmatmul.mubr.msk.f32.vlgmr.msra.gmra.mrb[0].mxu1 %vm50_vm0, %v5571_v21  ;;  %v659_v21 = vld [vmem:[#allocation2 + $0x120] sm:$0xff] }
  0x9b   :  { %6568 = vmatpush3.bf16.msra.mxu1 %v6565_v42 }
  0x9c   :  { %6570 = vmatprep.subr.bf16.mxu1 %v6569_v48 }
  0x9f   :  { %6572 = vmatpush3.bf16.msra.mxu1 %v6569_v48  ;;  %v6621_v48 = vpack.c.bf16 %v738_v44, %v737_v43 }
  0xa0   :  { %6574 = vmatprep.subr.bf16.mxu1 %v6573_v54 }
 0x16d   :  { %v5999_v23 = vpop.f32.mrb[0].mxu1 }
 0x16e   :  { %v123_v24 = vpop.f32.mrb[1].mxu1  ;;  %v7031_v26 = vadd.f32 %v5999_v23, %v49_v22  ;;  %v6613_v23 = vpack.c.bf16 %v659_v21, %v658_v20 }
 0x16f   :  { %v7029_v25 = vadd.f32 %v123_v24, %v49_v22  ;;  %v6589_v22 = vpack.c.bf16 %v422_v19, %v421_v13  ;;  %v423_v24 = vld [vmem:[#allocation2 + $0xc8] sm:$0xff] }
 0x170   :  { %v142_v28 = vsel %vm138_vm3, %v7031_v26, 0.0 }
 0x171   :  { %v139_v27 = vsel %vm138_vm3, %v7029_v25, 0.0 }
 0x172   :  { %140 = vadd.xlane.f32.xlu1 %v139_v27  ;;  %v424_v27 = vld [vmem:[#allocation2 + $0xd0] sm:$0xff] }
 0x176   :  { %143 = vadd.xlane.f32.xlu1 %v142_v28  ;;  %v660_v28 = vld [vmem:[#allocation2 + $0x128] sm:$0xff] }
 0x1ff   :  { %v141_v29 = vpop.xlane.xlu1 %140 }
 0x200   :  { %v146_v30 = vmul.f32 0.03125, %v141_v29  ;;  %v661_v29 = vld [vmem:[#allocation2 + $0x130] sm:$0xff] }
 0x202   :  { %v148_v31 = vsub.f32 %v7029_v25, %v146_v30  ;;  %v6593_v30 = vpack.c.bf16 %v424_v27, %v423_v24 }
 0x203   :  { %v144_v32 = vpop.xlane.xlu1 %143 }
 0x204   :  { %v147_v33 = vmul.f32 0.03125, %v144_v32  ;;  %v150_v34 = vmul.f32 %v148_v31, %v148_v31  ;;  %v579_v32 = vld [vmem:[#allocation2 + $0xf8] sm:$0xff] }
 0x206   :  { %v149_v35 = vsub.f32 %v7031_v26, %v147_v33  ;;  %v152_v36 = vsel %vm138_vm3, %v150_v34, 0.0  ;;  %v580_v33 = vld [vmem:[#allocation2 + $0x100] sm:$0xff]  ;;  %v816_v34 = vld [vmem:[#allocation2 + $0x158] sm:$0xff] }
 0x207   :  { %153 = vadd.xlane.f32.xlu0 %v152_v36  ;;  %v6605_v36 = vpack.c.bf16 %v580_v33, %v579_v32  ;;  %v133_v33 = vshrl.u32 %v27_v15, 7 }
 0x208   :  { %v151_v37 = vmul.f32 %v149_v35, %v149_v35 }
 0x209   :  { %vm134_vm6 = vcmp.ge.s32.totalorder %v133_v33, %v7023_v16 }
 0x20a   :  { %v155_v38 = vsel %vm138_vm3, %v151_v37, 0.0 }
 0x20b   :  { %156 = vadd.xlane.f32.xlu1 %v155_v38  ;;  %v581_v38 = vld [vmem:[#allocation2 + $0x108] sm:$0xff] }
 0x20c   :  { %v6609_v42 = vpack.c.bf16 %v582_v39, %v581_v38 }
 0x294   :  { %v154_v57 = vpop.xlane.xlu0 %153 }
 0x295   :  { %v158_v58 = vmul.f32 0.03125, %v154_v57  ;;  %v6649_v57 = vpack.c.bf16 %v977_v53, %v976_v52 }
 0x297   :  { %v160_v59 = vadd.f32 1e-05, %v158_v58 }
 0x298   :  { %v157_v60 = vpop.xlane.xlu1 %156 }
 0x299   :  { %6871 = vrsqrt.f32 %v160_v59  ;;  %v159_v61 = vmul.f32 0.03125, %v157_v60  ;;  %v897_v59 = vld [vmem:[#allocation2 + $0x188] sm:$0xff]  ;;  %v898_v60 = vld [vmem:[#allocation2 + $0x190] sm:$0xff] }
 0x29b   :  { %v161_v62 = vadd.f32 1e-05, %v159_v61  ;;  %v6641_v61 = vpack.c.bf16 %v898_v60, %v897_v59 }
 0x29d   :  { %6873 = vrsqrt.f32 %v161_v62  ;;  %v1053_v62 = vld [vmem:[#allocation2 + $0x1b8] sm:$0xff] }
 0x2a3   :  { %v6872_v63 = vpop.eup %6871 }
 0x2a4   :  { %v164_v1 = vmul.f32 %v6872_v63, %v148_v31  ;;  %v6617_v31 = vpack.c.bf16 %v661_v29, %v660_v28  ;;  %v1054_v63 = vld [vmem:[#allocation2 + $0x1c0] sm:$0xff] }
 0x2a6   :  { %v170_v3 = vmul.f32 %v5574_v0, %v164_v1  ;;  %v1055_v1 = vld [vmem:[#allocation2 + $0x1c8] sm:$0xff] }
 0x2a7   :  { %v6874_v4 = vpop.eup %6873 }
 0x2a8   :  { %v7041_v5 = vadd.f32 %v5575_v2, %v170_v3  ;;  %v165_v6 = vmul.f32 %v6874_v4, %v149_v35  ;;  %v817_v35 = vld [vmem:[#allocation2 + $0x160] sm:$0xff] }
 0x2a9   :  { %v6629_v37 = vpack.c.bf16 %v817_v35, %v816_v34  ;;  %v6985_v34 = vmov -1e+30  }
 0x2aa   :  { %v171_v8 = vmul.f32 %v5574_v0, %v165_v6  ;;  %6008 = vmatprep.mubr.msk.f32.mxu1 %vm138_vm3, %v7041_v5  ;;  %6030 = vmatprep.mubr.msk.f32.mxu0 %vm138_vm3, %v7041_v5  ;;  %v6653_v0 = vpack.c.bf16 %v1054_v63, %v1053_v62  ;;  %v7155_v35 = vsel %vm134_vm6, 0.0, %v6985_v34 }
 0x2ac   :  { %v7047_v12 = vadd.f32 %v5575_v2, %v171_v8  ;;  %v1056_v2 = vld [vmem:[#allocation2 + $0x1d0] sm:$0xff] }
 0x2ad   :  { %v6657_v3 = vpack.c.bf16 %v1056_v2, %v1055_v1 }
 0x2ae   :  { %6009 = vmatmul.mubr.msk.f32.vlgmr.msra.gmra.mrb[2].mxu1 %vm138_vm3, %v7047_v12  ;;  %6031 = vmatmul.mubr.msk.f32.vlgmr.msra.gmra.mrb[0].mxu0 %vm138_vm3, %v7047_v12 }
 0x2af   :  { %6576 = vmatpush3.bf16.msra.mxu1 %v6573_v54  ;;  %6600 = vmatpush3.bf16.msra.mxu0 %v6597_v56  ;;  %v6625_v54 = vpack.c.bf16 %v740_v51, %v739_v50  ;;  %v896_v56 = vld [vmem:[#allocation2 + $0x180] sm:$0xff] }
 0x2b0   :  { %6019 = vmatprep.mubr.msk.f32.mxu1 %vm138_vm3, %v7041_v5  ;;  %6052 = vmatprep.mubr.msk.f32.mxu0 %vm138_vm3, %v7041_v5  ;;  %v6637_v58 = vpack.c.bf16 %v896_v56, %v895_v55 }
 0x2b1   :  { %6578 = vmatprep.subr.bf16.mxu1 %v6577_v14  ;;  %6602 = vmatprep.subr.bf16.mxu0 %v6601_v17 }
 0x2b3   :  { %6580 = vmatpush3.bf16.msra.mxu1 %v6577_v14  ;;  %6604 = vmatpush3.bf16.msra.mxu0 %v6601_v17 }
 0x2b4   :  { %6590 = vmatprep.subr.bf16.mxu1 %v6589_v22  ;;  %6614 = vmatprep.subr.bf16.mxu0 %v6613_v23 }
 0x2b6   :  { %6020 = vmatmul.mubr.msk.f32.vlgmr.msra.gmra.mrb[4].mxu1 %vm138_vm3, %v7047_v12  ;;  %6053 = vmatmul.mubr.msk.f32.vlgmr.msra.gmra.mrb[2].mxu0 %vm138_vm3, %v7047_v12 }
 0x2b7   :  { %6592 = vmatpush3.bf16.msra.mxu1 %v6589_v22  ;;  %6041 = vmatprep.mubr.msk.f32.mxu1 %vm138_vm3, %v7041_v5 }
 0x2b8   :  { %6616 = vmatpush3.bf16.msra.mxu0 %v6613_v23  ;;  %6074 = vmatprep.mubr.msk.f32.mxu0 %vm138_vm3, %v7041_v5 }
 0x2b9   :  { %6594 = vmatprep.subr.bf16.mxu1 %v6593_v30  ;;  %6618 = vmatprep.subr.bf16.mxu0 %v6617_v31 }
 0x2bb   :  { %6596 = vmatpush3.bf16.msra.mxu1 %v6593_v30 }
 0x2bc   :  { %6620 = vmatpush3.bf16.msra.mxu0 %v6617_v31  ;;  %6606 = vmatprep.subr.bf16.mxu1 %v6605_v36 }
 0x2bd   :  { %6630 = vmatprep.subr.bf16.mxu0 %v6629_v37 }
 0x2be   :  { %6042 = vmatmul.mubr.msk.f32.vlgmr.msra.gmra.mrb[6].mxu1 %vm138_vm3, %v7047_v12 }
 0x2bf   :  { %6075 = vmatmul.mubr.msk.f32.vlgmr.msra.gmra.mrb[4].mxu0 %vm138_vm3, %v7047_v12  ;;  %6608 = vmatpush3.bf16.msra.mxu1 %v6605_v36 }
 0x2c0   :  { %6063 = vmatprep.mubr.msk.f32.mxu1 %vm138_vm3, %v7041_v5  ;;  %6632 = vmatpush3.bf16.msra.mxu0 %v6629_v37 }
 0x2c1   :  { %6096 = vmatprep.mubr.msk.f32.mxu0 %vm138_vm3, %v7041_v5  ;;  %6610 = vmatprep.subr.bf16.mxu1 %v6609_v42 }
 0x2c2   :  { %6634 = vmatprep.subr.bf16.mxu0 %v6633_v45 }
 0x2c3   :  { %6612 = vmatpush3.bf16.msra.mxu1 %v6609_v42 }
 0x2c4   :  { %6636 = vmatpush3.bf16.msra.mxu0 %v6633_v45  ;;  %6622 = vmatprep.subr.bf16.mxu1 %v6621_v48 }
 0x2c5   :  { %6646 = vmatprep.subr.bf16.mxu0 %v6645_v49 }
 0x2c6   :  { %6064 = vmatmul.mubr.msk.f32.vlgmr.msra.gmra.mrb[8].mxu1 %vm138_vm3, %v7047_v12 }
 0x2c7   :  { %6097 = vmatmul.mubr.msk.f32.vlgmr.msra.gmra.mrb[6].mxu0 %vm138_vm3, %v7047_v12  ;;  %6624 = vmatpush3.bf16.msra.mxu1 %v6621_v48 }
 0x2c8   :  { %6085 = vmatprep.mubr.msk.f32.mxu1 %vm138_vm3, %v7041_v5  ;;  %6648 = vmatpush3.bf16.msra.mxu0 %v6645_v49 }
 0x2c9   :  { %6118 = vmatprep.mubr.msk.f32.mxu0 %vm138_vm3, %v7041_v5  ;;  %6626 = vmatprep.subr.bf16.mxu1 %v6625_v54 }
 0x2ca   :  { %6650 = vmatprep.subr.bf16.mxu0 %v6649_v57 }
 0x2cb   :  { %6628 = vmatpush3.bf16.msra.mxu1 %v6625_v54 }
 0x2cc   :  { %6652 = vmatpush3.bf16.msra.mxu0 %v6649_v57  ;;  %6638 = vmatprep.subr.bf16.mxu1 %v6637_v58 }
 0x2cd   :  { %6132 = vmatprep.subr.mxu0 %v6983_v18 }
 0x2ce   :  { %6086 = vmatmul.mubr.msk.f32.vlgmr.msra.gmra.mrb[10].mxu1 %vm138_vm3, %v7047_v12 }
 0x2cf   :  { %6119 = vmatmul.mubr.msk.f32.vlgmr.msra.gmra.mrb[8].mxu0 %vm138_vm3, %v7047_v12  ;;  %6640 = vmatpush3.bf16.msra.mxu1 %v6637_v58 }
 0x2d0   :  { %6107 = vmatprep.mubr.msk.f32.mxu1 %vm138_vm3, %v7041_v5  ;;  %6642 = vmatprep.subr.bf16.mxu1 %v6641_v61 }
 0x2d1   :  { %6134 = vmatprep.mubr.msk.f32.mxu0 %vm6984_vm4, %v6983_v18 }
 0x2d3   :  { %6644 = vmatpush3.bf16.msra.mxu1 %v6641_v61 }
 0x2d4   :  { %6654 = vmatprep.subr.bf16.mxu1 %v6653_v0 }
 0x2d6   :  { %6108 = vmatmul.mubr.msk.f32.vlgmr.msra.gmra.mrb[12].mxu1 %vm138_vm3, %v7047_v12 }
 0x2d7   :  { %6656 = vmatpush3.bf16.msra.mxu1 %v6653_v0  ;;  %6129 = vmatprep.mubr.msk.f32.mxu1 %vm138_vm3, %v7041_v5 }
 0x2d8   :  { %6658 = vmatprep.subr.bf16.mxu1 %v6657_v3 }
 0x2db   :  { %6660 = vmatpush3.bf16.msra.mxu1 %v6657_v3 }
 0x2dc   :  { %6147 = vmatprep.subr.mxu1 %v6983_v18 }
 0x2de   :  { %6130 = vmatmul.mubr.msk.f32.vlgmr.msra.gmra.mrb[14].mxu1 %vm138_vm3, %v7047_v12 }
 0x2df   :  { %6149 = vmatprep.mubr.msk.f32.mxu1 %vm6984_vm4, %v6983_v18 }
 0x381   :  { %v6010_v4 = vpop.f32.mrb[2].mxu1  ;;  %v6032_v6 = vpop.f32.mrb[0].mxu0 }
 0x382   :  { %v254_v7 = vpop.f32.mrb[3].mxu1  ;;  %v412_v8 = vpop.f32.mrb[1].mxu0 }
 0x389   :  { %v6021_v5 = vpop.f32.mrb[4].mxu1  ;;  %v6054_v9 = vpop.f32.mrb[2].mxu0 }
 0x38a   :  { %v333_v10 = vpop.f32.mrb[5].mxu1  ;;  %v570_v11 = vpop.f32.mrb[3].mxu0  ;;  %6148 = vmatpush3.xpose.msk.msra.mxu1 %vm1132_vm5, %v6054_v9 }
 0x38b   :  { %6133 = vmatpush3.xpose.msk.msra.mxu0 %vm1132_vm5, %v333_v10  ;;  %6157 = vmatprep.subr.mxu1 %v6983_v18 }
 0x38c   :  { %6137 = vmatprep.subr.mxu0 %v6983_v18 }
 0x38e   :  { %6135 = vmatmul.mubr.msk.f32.vlgmr.msra.gmra.mrb[10].mxu0 %vm1132_vm5, %v254_v7 }
 0x38f   :  { %6138 = vmatpush3.xpose.msk.msra.mxu0 %vm1132_vm5, %v6021_v5  ;;  %6139 = vmatprep.mubr.msk.f32.mxu0 %vm6984_vm4, %v6983_v18 }
 0x390   :  { %6142 = vmatprep.subr.mxu0 %v6983_v18 }
 0x391   :  { %v6043_v12 = vpop.f32.mrb[6].mxu1 }
 0x392   :  { %v6076_v13 = vpop.f32.mrb[4].mxu0  ;;  %v491_v14 = vpop.f32.mrb[7].mxu1  ;;  %6140 = vmatmul.mubr.msk.f32.vlgmr.msra.gmra.mrb[12].mxu0 %vm1132_vm5, %v6010_v4  ;;  %6150 = vmatmul.mubr.msk.f32.vlgmr.msra.gmra.mrb[16].mxu1 %vm1132_vm5, %v6043_v12 }
 0x393   :  { %v728_v17 = vpop.f32.mrb[5].mxu0  ;;  %6143 = vmatpush3.xpose.msk.msra.mxu0 %vm1132_vm5, %v570_v11  ;;  %6144 = vmatprep.mubr.msk.f32.mxu0 %vm6984_vm4, %v6983_v18 }
 0x394   :  { %6152 = vmatprep.subr.mxu0 %v6983_v18  ;;  %6159 = vmatprep.mubr.msk.f32.mxu1 %vm6984_vm4, %v6983_v18 }
 0x396   :  { %6145 = vmatmul.mubr.msk.f32.vlgmr.msra.gmra.mrb[14].mxu0 %vm1132_vm5, %v491_v14 }
 0x397   :  { %6154 = vmatprep.mubr.msk.f32.mxu0 %vm6984_vm4, %v6983_v18 }
 0x399   :  { %v7119_v19 = vpop.f32.mrb[8].mxu1 }
 0x39a   :  { %v7121_v20 = vpop.f32.mrb[6].mxu0  ;;  %v7123_v21 = vpop.f32.mrb[9].mxu1 }
 0x39b   :  { %v7125_v22 = vpop.f32.mrb[7].mxu0 }
 0x3a1   :  { %v6087_v23 = vpop.f32.mrb[10].mxu1 }
 0x3a2   :  { %v6120_v24 = vpop.f32.mrb[8].mxu0  ;;  %v807_v27 = vpop.f32.mrb[11].mxu1  ;;  %6158 = vmatpush3.xpose.msk.msra.mxu1 %vm1132_vm5, %v6087_v23 }
 0x3a3   :  { %v1044_v28 = vpop.f32.mrb[9].mxu0  ;;  %6153 = vmatpush3.xpose.msk.msra.mxu0 %vm1132_vm5, %v807_v27  ;;  %6167 = vmatprep.subr.mxu1 %v6983_v18 }
 0x3a4   :  { %6162 = vmatprep.subr.mxu0 %v6983_v18 }
 0x3a5   :  { %6160 = vmatmul.mubr.msk.f32.vlgmr.msra.gmra.mrb[18].mxu1 %vm1132_vm5, %v6076_v13 }
 0x3a6   :  { %6155 = vmatmul.mubr.msk.f32.vlgmr.msra.gmra.mrb[16].mxu0 %vm1132_vm5, %v728_v17  ;;  %6168 = vmatpush3.xpose.msk.msra.mxu1 %vm1132_vm5, %v6120_v24 }
 0x3a7   :  { %6163 = vmatpush3.xpose.msk.msra.mxu0 %vm1132_vm5, %v1044_v28  ;;  %6169 = vmatprep.mubr.msk.f32.mxu1 %vm6984_vm4, %v6983_v18 }
 0x3a8   :  { %6177 = vmatprep.subr.mxu1 %v6983_v18  ;;  %6164 = vmatprep.mubr.msk.f32.mxu0 %vm6984_vm4, %v6983_v18 }
 0x3a9   :  { %v6109_v29 = vpop.f32.mrb[12].mxu1  ;;  %6172 = vmatprep.subr.mxu0 %v6983_v18 }
 0x3aa   :  { %v965_v30 = vpop.f32.mrb[13].mxu1  ;;  %6170 = vmatmul.mubr.msk.f32.vlgmr.msra.gmra.mrb[20].mxu1 %vm1132_vm5, %v6109_v29 }
 0x3ab   :  { %6178 = vmatpush3.msra.mxu1 %v6032_v6  ;;  %6165 = vmatmul.mubr.msk.f32.vlgmr.msra.gmra.mrb[18].mxu0 %vm1132_vm5, %v965_v30 }
 0x3ac   :  { %6173 = vmatpush3.msra.mxu0 %v412_v8  ;;  %6174 = vmatprep.mubr.msk.f32.mxu0 %vm6984_vm4, %v6983_v18 }
 0x3ad   :  { %6182 = vmatprep.subr.mxu0 %v6983_v18  ;;  %6179 = vmatprep.mubr.msk.f32.mxu1 %vm6984_vm4, %v6983_v18 }
 0x3ae   :  { %6187 = vmatprep.subr.mxu1 %v6983_v18 }
 0x3b1   :  { %v7149_v31 = vpop.f32.mrb[14].mxu1 }
 0x3b2   :  { %v7151_v32 = vpop.f32.mrb[15].mxu1 }
 0x461   :  { %v1205_v36 = vpop.f32.mrb[10].mxu0 }
 0x462   :  { %v1741_v37 = vmul.f32 0.35355338, %v1205_v36  ;;  %v6136_v38 = vpop.f32.mrb[11].mxu0 }
 0x464   :  { %v1749_v39 = vadd.f32 %v1741_v37, %v7155_v35 }
 0x465   :  { %v1281_v40 = vpop.f32.mrb[12].mxu0  ;;  %v1433_v41 = vpop.f32.mrb[16].mxu1 }
 0x466   :  { %v1742_v42 = vmul.f32 0.35355338, %v1281_v40  ;;  %v6141_v43 = vpop.f32.mrb[13].mxu0  ;;  %v6151_v44 = vpop.f32.mrb[17].mxu1  ;;  %v1744_v45 = vmul.f32 0.35355338, %v1433_v41 }
 0x467   :  { %v1757_v46 = vsel %vm1132_vm5, %v1749_v39, -inf }
 0x468   :  { %1758 = vmax.xlane.f32.xlu1 %v1757_v46  ;;  %v1750_v15 = vadd.f32 %v1742_v42, %v7155_v35  ;;  %v1752_v50 = vadd.f32 %v1744_v45, %v7155_v35 }
 0x469   :  { %v1357_v16 = vpop.f32.mrb[14].mxu0 }
 0x46a   :  { %v6146_v47 = vpop.f32.mrb[15].mxu0  ;;  %v1760_v48 = vsel %vm1132_vm5, %v1750_v15, -inf  ;;  %v1743_v49 = vmul.f32 0.35355338, %v1357_v16  ;;  %v1766_v51 = vsel %vm1132_vm5, %v1752_v50, -inf }
 0x46c   :  { %1761 = vmax.xlane.f32.xlu1 %v1760_v48  ;;  %v1751_v52 = vadd.f32 %v1743_v49, %v7155_v35 }
 0x46e   :  { %v1763_v53 = vsel %vm1132_vm5, %v1751_v52, -inf }
 0x470   :  { %1767 = vmax.xlane.f32.xlu1 %v1766_v51 }
 0x474   :  { %1764 = vmax.xlane.f32.xlu1 %v1763_v53 }
 0x478   :  { %v1585_v54 = vpop.f32.mrb[18].mxu1 }
 0x479   :  { %v1746_v55 = vmul.f32 0.35355338, %v1585_v54  ;;  %v1509_v56 = vpop.f32.mrb[16].mxu0  ;;  %v6161_v57 = vpop.f32.mrb[19].mxu1 }
 0x47a   :  { %v1745_v58 = vmul.f32 0.35355338, %v1509_v56  ;;  %v6156_v59 = vpop.f32.mrb[17].mxu0 }
 0x47b   :  { %v1754_v60 = vadd.f32 %v1746_v55, %v7155_v35 }
 0x47c   :  { %v1753_v63 = vadd.f32 %v1745_v58, %v7155_v35 }
 0x47d   :  { %v1737_v61 = vpop.f32.mrb[20].mxu1  ;;  %v1772_v62 = vsel %vm1132_vm5, %v1754_v60, -inf }
 0x47e   :  { %v1748_v0 = vmul.f32 0.35355338, %v1737_v61  ;;  %v1661_v1 = vpop.f32.mrb[18].mxu0  ;;  %1773 = vmax.xlane.f32.xlu1 %v1772_v62  ;;  %v6171_v2 = vpop.f32.mrb[21].mxu1  ;;  %v1769_v7 = vsel %vm1132_vm5, %v1753_v63, -inf }
 0x47f   :  { %v1747_v3 = vmul.f32 0.35355338, %v1661_v1  ;;  %v6166_v4 = vpop.f32.mrb[19].mxu0 }
 0x480   :  { %v1756_v6 = vadd.f32 %v1748_v0, %v7155_v35 }
 0x481   :  { %v1755_v8 = vadd.f32 %v1747_v3, %v7155_v35 }
 0x482   :  { %1770 = vmax.xlane.f32.xlu1 %v1769_v7  ;;  %v1778_v5 = vsel %vm1132_vm5, %v1756_v6, -inf }
 0x483   :  { %1779 = vmax.xlane.f32.xlu0 %v1778_v5  ;;  %v1775_v9 = vsel %vm1132_vm5, %v1755_v8, -inf }
 0x486   :  { %1776 = vmax.xlane.f32.xlu1 %v1775_v9 }
 0x4f5   :  { %v1759_v10 = vpop.xlane.xlu1 %1758 }
 0x4f6   :  { %v1781_v11 = vsub.f32 %v1749_v39, %v1759_v10 }
 0x4f8   :  { %v1789_v12 = vmul.f32 1.442695, %v1781_v11 }
 0x4f9   :  { %v1762_v13 = vpop.xlane.xlu1 %1761 }
 0x4fa   :  { %6875 = vpow2.f32 %v1789_v12  ;;  %v1782_v14 = vsub.f32 %v1750_v15, %v1762_v13 }
 0x4fc   :  { %v1791_v17 = vmul.f32 1.442695, %v1782_v14 }
 0x4fd   :  { %v1768_v23 = vpop.xlane.xlu1 %1767 }
 0x4fe   :  { %6877 = vpow2.f32 %v1791_v17  ;;  %v1784_v24 = vsub.f32 %v1752_v50, %v1768_v23 }
 0x500   :  { %v1795_v27 = vmul.f32 1.442695, %v1784_v24 }
 0x501   :  { %v1765_v28 = vpop.xlane.xlu1 %1764 }
 0x502   :  { %6879 = vpow2.f32 %v1795_v27  ;;  %v1783_v29 = vsub.f32 %v1751_v52, %v1765_v28 }
 0x504   :  { %v6876_v30 = vpop.eup %6875  ;;  %v1793_v33 = vmul.f32 1.442695, %v1783_v29 }
 0x505   :  { %v1805_v34 = vsel %vm1132_vm5, %v6876_v30, 0.0 }
 0x506   :  { %6881 = vpow2.f32 %v1793_v33  ;;  %1806 = vadd.xlane.f32.xlu1 %v1805_v34  ;;  %v2462_v33 = vld [vmem:[#allocation2 + $0x1e0] sm:$0xff] }
 0x508   :  { %v6878_v36 = vpop.eup %6877 }
 0x509   :  { %v1808_v37 = vsel %vm1132_vm5, %v6878_v36, 0.0 }
 0x50a   :  { %1809 = vadd.xlane.f32.xlu0 %v1808_v37  ;;  %v2463_v37 = vld [vmem:[#allocation2 + $0x1e8] sm:$0xff] }
 0x50b   :  { %v1774_v38 = vpop.xlane.xlu1 %1773 }
 0x50c   :  { %v6880_v39 = vpop.eup %6879  ;;  %v1786_v40 = vsub.f32 %v1754_v60, %v1774_v38  ;;  %v2464_v38 = vld [vmem:[#allocation2 + $0x1f0] sm:$0xff] }
 0x50d   :  { %v1814_v41 = vsel %vm1132_vm5, %v6880_v39, 0.0 }
 0x50e   :  { %v1799_v42 = vmul.f32 1.442695, %v1786_v40  ;;  %1815 = vadd.xlane.f32.xlu0 %v1814_v41 }
 0x50f   :  { %v1771_v43 = vpop.xlane.xlu1 %1770 }
 0x510   :  { %v6882_v44 = vpop.eup %6881  ;;  %6883 = vpow2.f32 %v1799_v42  ;;  %v1785_v45 = vsub.f32 %v1753_v63, %v1771_v43  ;;  %v1780_v46 = vpop.xlane.xlu0 %1779 }
 0x511   :  { %v1788_v15 = vsub.f32 %v1756_v6, %v1780_v46  ;;  %v1811_v16 = vsel %vm1132_vm5, %v6882_v44, 0.0 }
 0x512   :  { %v1797_v47 = vmul.f32 1.442695, %v1785_v45  ;;  %1812 = vadd.xlane.f32.xlu1 %v1811_v16 }
 0x513   :  { %v1803_v48 = vmul.f32 1.442695, %v1788_v15  ;;  %v1777_v49 = vpop.xlane.xlu1 %1776 }
 0x514   :  { %6885 = vpow2.f32 %v1797_v47  ;;  %v1787_v50 = vsub.f32 %v1755_v8, %v1777_v49 }
 0x515   :  { %6887 = vpow2.f32 %v1803_v48 }
 0x516   :  { %v1801_v51 = vmul.f32 1.442695, %v1787_v50 }
 0x518   :  { %6889 = vpow2.f32 %v1801_v51 }
 0x51a   :  { %v6884_v52 = vpop.eup %6883 }
 0x51b   :  { %v1820_v53 = vsel %vm1132_vm5, %v6884_v52, 0.0 }
 0x51c   :  { %1821 = vadd.xlane.f32.xlu0 %v1820_v53 }
 0x51e   :  { %v6886_v54 = vpop.eup %6885 }
 0x51f   :  { %v6888_v55 = vpop.eup %6887  ;;  %v1817_v56 = vsel %vm1132_vm5, %v6886_v54, 0.0 }
 0x520   :  { %1818 = vadd.xlane.f32.xlu1 %v1817_v56  ;;  %v1826_v57 = vsel %vm1132_vm5, %v6888_v55, 0.0 }
 0x521   :  { %1827 = vadd.xlane.f32.xlu0 %v1826_v57 }
 0x522   :  { %v6890_v58 = vpop.eup %6889 }
 0x523   :  { %v1823_v59 = vsel %vm1132_vm5, %v6890_v58, 0.0 }
 0x524   :  { %1824 = vadd.xlane.f32.xlu1 %v1823_v59  ;;  %v5626_v59 = vld [vmem:[#allocation2 + $0x1f8] ss:$0 sm:$0xff] }
 0x593   :  { %v1807_v60 = vpop.xlane.xlu1 %1806 }
 0x594   :  { %6891 = vrcp.f32 %v1807_v60 }
 0x597   :  { %v1810_v61 = vpop.xlane.xlu0 %1809 }
 0x598   :  { %6893 = vrcp.f32 %v1810_v61 }
 0x59b   :  { %v1816_v62 = vpop.xlane.xlu0 %1815 }
 0x59c   :  { %6895 = vrcp.f32 %v1816_v62 }
 0x59e   :  { %v6892_v63 = vpop.eup %6891 }
 0x59f   :  { %v1837_v0 = vmul.f32 %v6892_v63, %v6876_v30  ;;  %v1813_v1 = vpop.xlane.xlu1 %1812  ;;  %v2461_v30 = vld [vmem:[#allocation2 + $0x1d8] sm:$0xff] }
 0x5a0   :  { %6897 = vrcp.f32 %v1813_v1  ;;  %v6661_v34 = vpack.c.bf16 %v2462_v33, %v2461_v30  ;;  %v2693_v30 = vld [vmem:[#allocation2 + $0x268] sm:$0xff]  ;;  %v2694_v33 = vld [vmem:[#allocation2 + $0x270] sm:$0xff] }
 0x5a1   :  { %6175 = vmatmul.mubr.msk.f32.vlgmr.msra.gmra.mrb[20].mxu0 %vm1132_vm5, %v1837_v0 }
 0x5a2   :  { %v6894_v2 = vpop.eup %6893  ;;  %6183 = vmatpush3.msra.mxu0 %v7123_v21  ;;  %6184 = vmatprep.mubr.msk.f32.mxu0 %vm6984_vm4, %v6983_v18 }
 0x5a3   :  { %v1838_v3 = vmul.f32 %v6894_v2, %v6878_v36  ;;  %6192 = vmatprep.subr.mxu0 %v6983_v18 }
 0x5a5   :  { %6180 = vmatmul.mubr.msk.f32.vlgmr.msra.gmra.mrb[22].mxu1 %vm1132_vm5, %v1838_v3 }
 0x5a6   :  { %v6896_v4 = vpop.eup %6895  ;;  %6188 = vmatpush3.msra.mxu1 %v7119_v19  ;;  %6189 = vmatprep.mubr.msk.f32.mxu1 %vm6984_vm4, %v6983_v18 }
 0x5a7   :  { %v1840_v6 = vmul.f32 %v6896_v4, %v6880_v39  ;;  %6197 = vmatprep.subr.mxu1 %v6983_v18  ;;  %v6665_v39 = vpack.c.bf16 %v2464_v38, %v2463_v37  ;;  %v2697_v38 = vld [vmem:[#allocation2 + $0x288] sm:$0xff] }
 0x5a9   :  { %6190 = vmatmul.mubr.msk.f32.vlgmr.msra.gmra.mrb[24].mxu1 %vm1132_vm5, %v1840_v6  ;;  %v1822_v21 = vpop.xlane.xlu0 %1821 }
 0x5aa   :  { %v6898_v7 = vpop.eup %6897  ;;  %6198 = vmatpush3.msra.mxu1 %v7121_v20  ;;  %6899 = vrcp.f32 %v1822_v21  ;;  %6199 = vmatprep.mubr.msk.f32.mxu1 %vm6984_vm4, %v6983_v18 }
 0x5ab   :  { %v1839_v8 = vmul.f32 %v6898_v7, %v6882_v44  ;;  %6207 = vmatprep.subr.mxu1 %v6983_v18 }
 0x5ad   :  { %6185 = vmatmul.mubr.msk.f32.vlgmr.msra.gmra.mrb[22].mxu0 %vm1132_vm5, %v1839_v8  ;;  %v1819_v19 = vpop.xlane.xlu1 %1818 }
 0x5ae   :  { %6193 = vmatpush3.msra.mxu0 %v7125_v22  ;;  %6901 = vrcp.f32 %v1819_v19  ;;  %v1828_v5 = vpop.xlane.xlu0 %1827  ;;  %6194 = vmatprep.mubr.msk.f32.mxu0 %vm6984_vm4, %v6983_v18 }
 0x5af   :  { %6903 = vrcp.f32 %v1828_v5  ;;  %6202 = vmatprep.subr.mxu0 %v6983_v18 }
 0x5b1   :  { %v1825_v20 = vpop.xlane.xlu1 %1824 }
 0x5b2   :  { %6905 = vrcp.f32 %v1825_v20  ;;  %v2595_v20 = vld [vmem:[#allocation2 + $0x210] sm:$0xff] }
 0x5b4   :  { %v6900_v9 = vpop.eup %6899 }
 0x5b5   :  { %v1842_v10 = vmul.f32 %v6900_v9, %v6884_v52  ;;  %v2596_v9 = vld [vmem:[#allocation2 + $0x218] sm:$0xff] }
 0x5b7   :  { %6200 = vmatmul.mubr.msk.f32.vlgmr.msra.gmra.mrb[26].mxu1 %vm1132_vm5, %v1842_v10  ;;  %v6669_v10 = vpack.c.bf16 %v2596_v9, %v2595_v20 }
 0x5b8   :  { %v6902_v11 = vpop.eup %6901  ;;  %6208 = vmatpush3.msra.mxu1 %v7149_v31  ;;  %6209 = vmatprep.mubr.msk.f32.mxu1 %vm6984_vm4, %v6983_v18 }
 0x5b9   :  { %v6904_v22 = vpop.eup %6903  ;;  %v1841_v12 = vmul.f32 %v6902_v11, %v6886_v54  ;;  %6670 = vmatprep.subr.bf16.mxu1 %v6669_v10  ;;  %v2597_v11 = vld [vmem:[#allocation2 + $0x220] sm:$0xff] }
 0x5ba   :  { %v1844_v13 = vmul.f32 %v6904_v22, %v6888_v55  ;;  %v2598_v22 = vld [vmem:[#allocation2 + $0x228] sm:$0xff] }
 0x5bb   :  { %6195 = vmatmul.mubr.msk.f32.vlgmr.msra.gmra.mrb[24].mxu0 %vm1132_vm5, %v1841_v12  ;;  %v6673_v12 = vpack.c.bf16 %v2598_v22, %v2597_v11 }
 0x5bc   :  { %v6906_v14 = vpop.eup %6905  ;;  %6203 = vmatpush3.msra.mxu0 %v7151_v32  ;;  %6210 = vmatmul.mubr.msk.f32.vlgmr.msra.gmra.mrb[28].mxu1 %vm1132_vm5, %v1844_v13  ;;  %v2687_v13 = vld [vmem:[#allocation2 + $0x238] sm:$0xff] }
 0x5bd   :  { %v1843_v17 = vmul.f32 %v6906_v14, %v6890_v58  ;;  %6204 = vmatprep.mubr.msk.f32.mxu0 %vm6984_vm4, %v6983_v18  ;;  %6662 = vmatprep.subr.bf16.mxu0 %v6661_v34  ;;  %v2688_v14 = vld [vmem:[#allocation2 + $0x240] sm:$0xff] }
 0x5be   :  { %6672 = vmatpush3.bf16.msra.mxu1 %v6669_v10 }
 0x5bf   :  { %6205 = vmatmul.mubr.msk.f32.vlgmr.msra.gmra.mrb[26].mxu0 %vm1132_vm5, %v1843_v17  ;;  %6674 = vmatprep.subr.bf16.mxu1 %v6673_v12  ;;  %v2689_v17 = vld [vmem:[#allocation2 + $0x248] sm:$0xff] }
 0x5c0   :  { %6664 = vmatpush3.bf16.msra.mxu0 %v6661_v34  ;;  %v6689_v34 = vpack.c.bf16 %v2694_v33, %v2693_v30  ;;  %v2829_v33 = vld [vmem:[#allocation2 + $0x2e0] sm:$0xff] }
 0x5c1   :  { %6666 = vmatprep.subr.bf16.mxu0 %v6665_v39 }
 0x5c2   :  { %6676 = vmatpush3.bf16.msra.mxu1 %v6673_v12 }
 0x5c4   :  { %6668 = vmatpush3.bf16.msra.mxu0 %v6665_v39  ;;  %v2698_v39 = vld [vmem:[#allocation2 + $0x290] sm:$0xff] }
 0x674   :  { %v1914_v31 = vpop.f32.mrb[20].mxu0 }
 0x675   :  { %v6176_v23 = vpop.f32.mrb[21].mxu0 }
 0x676   :  { %v2690_v23 = vld [vmem:[#allocation2 + $0x250] sm:$0xff] }
 0x678   :  { %v1987_v24 = vpop.f32.mrb[22].mxu1 }
 0x679   :  { %v6181_v27 = vpop.f32.mrb[23].mxu1 }
 0x67a   :  { %v2691_v27 = vld [vmem:[#allocation2 + $0x258] sm:$0xff] }
 0x67c   :  { %v2133_v28 = vpop.f32.mrb[24].mxu1 }
 0x67d   :  { %2433 = vrot.lane.b32.xlu0 %v2133_v28, %s6981_s20  ;;  %v6191_v29 = vpop.f32.mrb[25].mxu1  ;;  %v2692_v28 = vld [vmem:[#allocation2 + $0x260] sm:$0xff] }
 0x67e   :  { %v6685_v29 = vpack.c.bf16 %v2692_v28, %v2691_v27  ;;  %v3149_v27 = vld [vmem:[#allocation2 + $0x350] sm:$0xff] }
 0x680   :  { %v2060_v32 = vpop.f32.mrb[22].mxu0 }
 0x681   :  { %2431 = vrot.lane.b32.xlu1 %v2060_v32, %s6981_s20  ;;  %v6186_v36 = vpop.f32.mrb[23].mxu0  ;;  %v2695_v32 = vld [vmem:[#allocation2 + $0x278] sm:$0xff] }
 0x682   :  { %v2696_v36 = vld [vmem:[#allocation2 + $0x280] sm:$0xff] }
 0x683   :  { %v6693_v37 = vpack.c.bf16 %v2696_v36, %v2695_v32  ;;  %v3151_v32 = vld [vmem:[#allocation2 + $0x360] sm:$0xff] }
 0x68a   :  { %v2279_v40 = vpop.f32.mrb[26].mxu1 }
 0x68b   :  { %2441 = vrot.lane.b32.xlu1 %v2279_v40, %s6986_s0  ;;  %v6201_v41 = vpop.f32.mrb[27].mxu1  ;;  %v6697_v40 = vpack.c.bf16 %v2698_v39, %v2697_v38  ;;  %v2912_v39 = vld [vmem:[#allocation2 + $0x2f0] sm:$0xff] }
 0x68c   :  { %v2699_v41 = vld [vmem:[#allocation2 + $0x298] sm:$0xff] }
 0x68e   :  { %v2206_v42 = vpop.f32.mrb[24].mxu0 }
 0x68f   :  { %v6196_v43 = vpop.f32.mrb[25].mxu0  ;;  %2439 = vrot.lane.b32.xlu1 %v2206_v42, %s6986_s0  ;;  %v2425_v44 = vpop.f32.mrb[28].mxu1  ;;  %v2700_v42 = vld [vmem:[#allocation2 + $0x2a0] sm:$0xff] }
 0x690   :  { %v6211_v45 = vpop.f32.mrb[29].mxu1  ;;  %v6701_v43 = vpack.c.bf16 %v2700_v42, %v2699_v41  ;;  %v3307_v41 = vld [vmem:[#allocation2 + $0x390] sm:$0xff] }
 0x692   :  { %v2352_v46 = vpop.f32.mrb[26].mxu0 }
 0x693   :  { %v6206_v15 = vpop.f32.mrb[27].mxu0  ;;  %2447 = vrot.lane.b32.xlu0 %v2352_v46, %s6987_s1  ;;  %2449 = vrot.lane.b32.xlu1 %v2425_v44, %s6987_s1 }
 0x6ef   :  { %v2434_v48 = vpop.permute.xlu0 %2433 }
 0x6f0   :  { %v2454_v50 = vsel %vm1132_vm5, %v1987_v24, %v2434_v48  ;;  %v6681_v24 = vpack.c.bf16 %v2690_v23, %v2689_v17  ;;  %v2827_v23 = vld [vmem:[#allocation2 + $0x2d0] sm:$0xff] }
 0x6f3   :  { %v2432_v16 = vpop.permute.xlu1 %2431 }
 0x6f4   :  { %v2453_v51 = vsel %vm1132_vm5, %v1914_v31, %v2432_v16  ;;  %v6677_v31 = vpack.c.bf16 %v2688_v14, %v2687_v13 }
 0x6f6   :  { %6678 = vmatprep.subr.bf16.mxu0 %v6677_v31 }
 0x6fd   :  { %v2442_v47 = vpop.permute.xlu1 %2441 }
 0x6fe   :  { %v2457_v52 = vsel %vm2455_vm7, %v2454_v50, %v2442_v47 }
 0x701   :  { %v2440_v49 = vpop.permute.xlu1 %2439 }
 0x702   :  { %v2456_v53 = vsel %vm2455_vm7, %v2453_v51, %v2440_v49  ;;  %v5627_v49 = vld [vmem:[#allocation2 + $0x200] ss:$0 sm:$0xff]  ;;  %v5628_v51 = vld [vmem:[#allocation2 + $0x208] ss:$0 sm:$0xff] }
 0x705   :  { %v2448_v54 = vpop.permute.xlu0 %2447  ;;  %v2450_v55 = vpop.permute.xlu1 %2449 }
 0x706   :  { %v2459_v56 = vsel %vm2458_vm8, %v2456_v53, %v2448_v54  ;;  %v2460_v57 = vsel %vm2458_vm8, %v2457_v52, %v2450_v55 }
 0x707   :  { %6220 = vmatprep.mubr.msk.f32.mxu0 %vm138_vm3, %v2459_v56 }
 0x708   :  { %6221 = vmatmul.mubr.msk.f32.vlgmr.msra.gmra.mrb[28].mxu0 %vm138_vm3, %v2460_v57 }
 0x709   :  { %6680 = vmatpush3.bf16.msra.mxu0 %v6677_v31 }
 0x70a   :  { %6682 = vmatprep.subr.bf16.mxu0 %v6681_v24 }
 0x70d   :  { %6684 = vmatpush3.bf16.msra.mxu0 %v6681_v24  ;;  %v2828_v24 = vld [vmem:[#allocation2 + $0x2d8] sm:$0xff] }
 0x70e   :  { %6686 = vmatprep.subr.bf16.mxu0 %v6685_v29  ;;  %v6709_v28 = vpack.c.bf16 %v2828_v24, %v2827_v23  ;;  %v3625_v23 = vld [vmem:[#allocation2 + $0x420] sm:$0xff]  ;;  %v3626_v24 = vld [vmem:[#allocation2 + $0x428] sm:$0xff] }
 0x710   :  { %6710 = vmatprep.subr.bf16.mxu1 %v6709_v28 }
 0x711   :  { %6688 = vmatpush3.bf16.msra.mxu0 %v6685_v29  ;;  %v3150_v29 = vld [vmem:[#allocation2 + $0x358] sm:$0xff] }
 0x712   :  { %6690 = vmatprep.subr.bf16.mxu0 %v6689_v34  ;;  %v6741_v30 = vpack.c.bf16 %v3150_v29, %v3149_v27  ;;  %v3229_v29 = vld [vmem:[#allocation2 + $0x378] sm:$0xff] }
 0x715   :  { %6692 = vmatpush3.bf16.msra.mxu0 %v6689_v34  ;;  %v2830_v34 = vld [vmem:[#allocation2 + $0x2e8] sm:$0xff] }
 0x716   :  { %6694 = vmatprep.subr.bf16.mxu0 %v6693_v37  ;;  %v6713_v36 = vpack.c.bf16 %v2830_v34, %v2829_v33  ;;  %v3230_v34 = vld [vmem:[#allocation2 + $0x380] sm:$0xff] }
 0x719   :  { %6696 = vmatpush3.bf16.msra.mxu0 %v6693_v37  ;;  %v3152_v37 = vld [vmem:[#allocation2 + $0x368] sm:$0xff] }
 0x71a   :  { %6698 = vmatprep.subr.bf16.mxu0 %v6697_v40  ;;  %v6745_v38 = vpack.c.bf16 %v3152_v37, %v3151_v32  ;;  %v3231_v32 = vld [vmem:[#allocation2 + $0x388] sm:$0xff]  ;;  %v3386_v37 = vld [vmem:[#allocation2 + $0x3b0] sm:$0xff] }
 0x71d   :  { %6700 = vmatpush3.bf16.msra.mxu0 %v6697_v40  ;;  %v2913_v40 = vld [vmem:[#allocation2 + $0x2f8] sm:$0xff] }
 0x71e   :  { %6702 = vmatprep.subr.bf16.mxu0 %v6701_v43  ;;  %v6717_v42 = vpack.c.bf16 %v2913_v40, %v2912_v39  ;;  %v3388_v40 = vld [vmem:[#allocation2 + $0x3c0] sm:$0xff] }
 0x721   :  { %6704 = vmatpush3.bf16.msra.mxu0 %v6701_v43  ;;  %v3308_v43 = vld [vmem:[#allocation2 + $0x398] sm:$0xff] }
 0x7db   :  { %v6222_v58 = vpop.f32.mrb[28].mxu0 }
 0x7dc   :  { %v2547_v60 = vadd.f32 %v6222_v58, %v7031_v26  ;;  %v2537_v61 = vpop.f32.mrb[29].mxu0  ;;  %v2701_v58 = vld [vmem:[#allocation2 + $0x2a8] sm:$0xff] }
 0x7dd   :  { %v2546_v62 = vadd.f32 %v2537_v61, %v7029_v25  ;;  %v5629_v61 = vld [vmem:[#allocation2 + $0x230] ss:$0 sm:$0xff] }
 0x7de   :  { %v7227_v63 = vadd.f32 %v5626_v59, %v2547_v60 }
 0x7df   :  { %v7229_v0 = vadd.f32 %v5626_v59, %v2546_v62  ;;  %v2702_v59 = vld [vmem:[#allocation2 + $0x2b0] sm:$0xff] }
 0x7e0   :  { %v2560_v1 = vsel %vm138_vm3, %v7227_v63, 0.0  ;;  %v6705_v60 = vpack.c.bf16 %v2702_v59, %v2701_v58  ;;  %v2915_v58 = vld [vmem:[#allocation2 + $0x308] sm:$0xff]  ;;  %v3309_v59 = vld [vmem:[#allocation2 + $0x3a0] sm:$0xff] }
 0x7e1   :  { %2561 = vadd.xlane.f32.xlu1 %v2560_v1  ;;  %v2557_v2 = vsel %vm138_vm3, %v7229_v0, 0.0 }
 0x7e2   :  { %2558 = vadd.xlane.f32.xlu0 %v2557_v2  ;;  %6706 = vmatprep.subr.bf16.mxu0 %v6705_v60 }
 0x7e3   :  { %6708 = vmatpush3.bf16.msra.mxu0 %v6705_v60  ;;  %v3310_v60 = vld [vmem:[#allocation2 + $0x3a8] sm:$0xff] }
 0x7e4   :  { %6742 = vmatprep.subr.bf16.mxu0 %v6741_v30 }
 0x86e   :  { %v2562_v3 = vpop.xlane.xlu1 %2561 }
 0x86f   :  { %v2564_v4 = vmul.f32 0.03125, %v2562_v3  ;;  %v2559_v6 = vpop.xlane.xlu0 %2558 }
 0x870   :  { %v2563_v21 = vmul.f32 0.03125, %v2559_v6 }
 0x871   :  { %v7236_v26 = vsub.f32 %v7227_v63, %v2564_v4 }
 0x872   :  { %v2565_v25 = vsub.f32 %v7229_v0, %v2563_v21 }
 0x873   :  { %v2568_v19 = vmul.f32 %v7236_v26, %v7236_v26 }
 0x874   :  { %v2567_v7 = vmul.f32 %v2565_v25, %v2565_v25 }
 0x875   :  { %v2572_v5 = vsel %vm138_vm3, %v2568_v19, 0.0 }
 0x876   :  { %v2569_v8 = vsel %vm138_vm3, %v2567_v7, 0.0 }
 0x877   :  { %2570 = vadd.xlane.f32.xlu0 %v2569_v8 }
 0x87b   :  { %2573 = vadd.xlane.f32.xlu0 %v2572_v5 }
 0x904   :  { %v2571_v44 = vpop.xlane.xlu0 %2570 }
 0x905   :  { %v2575_v45 = vmul.f32 0.03125, %v2571_v44  ;;  %v6757_v44 = vpack.c.bf16 %v3308_v43, %v3307_v41  ;;  %v3389_v41 = vld [vmem:[#allocation2 + $0x3c8] sm:$0xff]  ;;  %v3544_v43 = vld [vmem:[#allocation2 + $0x3f0] sm:$0xff] }
 0x907   :  { %v2577_v46 = vadd.f32 1e-05, %v2575_v45 }
 0x908   :  { %v2574_v15 = vpop.xlane.xlu0 %2573 }
 0x909   :  { %6907 = vrsqrt.f32 %v2577_v46  ;;  %v2576_v16 = vmul.f32 0.03125, %v2574_v15 }
 0x90b   :  { %v2578_v47 = vadd.f32 1e-05, %v2576_v16 }
 0x90d   :  { %6909 = vrsqrt.f32 %v2578_v47 }
 0x913   :  { %v6908_v48 = vpop.eup %6907 }
 0x914   :  { %v2581_v50 = vmul.f32 %v6908_v48, %v2565_v25 }
 0x916   :  { %v2587_v52 = vmul.f32 %v5627_v49, %v2581_v50  ;;  %v5633_v50 = vld [vmem:[#allocation2 + $0x2c0] ss:$0 sm:$0xff] }
 0x917   :  { %v6910_v53 = vpop.eup %6909 }
 0x918   :  { %v2582_v54 = vmul.f32 %v6910_v53, %v7236_v26  ;;  %v2593_v55 = vadd.f32 %v5628_v51, %v2587_v52  ;;  %v5632_v26 = vld [vmem:[#allocation2 + $0x2b8] ss:$0 sm:$0xff] }
 0x91a   :  { %v2588_v56 = vmul.f32 %v5627_v49, %v2582_v54  ;;  %6231 = vmatprep.mubr.msk.f32.mxu1 %vm138_vm3, %v2593_v55  ;;  %v5634_v54 = vld [vmem:[#allocation2 + $0x2c8] ss:$0 sm:$0xff] }
 0x91c   :  { %v2594_v57 = vadd.f32 %v5628_v51, %v2588_v56 }
 0x91e   :  { %6232 = vmatmul.mubr.msk.f32.vlgmr.msra.gmra.mrb[30].mxu1 %vm138_vm3, %v2594_v57  ;;  %v2914_v57 = vld [vmem:[#allocation2 + $0x300] sm:$0xff] }
 0x91f   :  { %6712 = vmatpush3.bf16.msra.mxu1 %v6709_v28  ;;  %v3228_v28 = vld [vmem:[#allocation2 + $0x370] sm:$0xff] }
 0x920   :  { %6714 = vmatprep.subr.bf16.mxu1 %v6713_v36  ;;  %v6749_v33 = vpack.c.bf16 %v3229_v29, %v3228_v28 }
 0x923   :  { %6716 = vmatpush3.bf16.msra.mxu1 %v6713_v36  ;;  %v6753_v36 = vpack.c.bf16 %v3231_v32, %v3230_v34 }
 0x924   :  { %6718 = vmatprep.subr.bf16.mxu1 %v6717_v42 }
 0x9f1   :  { %v6233_v62 = vpop.f32.mrb[30].mxu1 }
 0x9f2   :  { %v2682_v1 = vadd.f32 %v6233_v62, %v5629_v61  ;;  %v2676_v2 = vpop.f32.mrb[31].mxu1 }
 0x9f3   :  { %v2677_v3 = vadd.f32 %v5629_v61, %v2676_v2  ;;  %v6721_v2 = vpack.c.bf16 %v2915_v58, %v2914_v57 }
 0x9f4   :  { %v2686_v6 = vmax.f32 %v2682_v1, 0.0  ;;  %v2991_v1 = vld [vmem:[#allocation2 + $0x310] sm:$0xff] }
 0x9f5   :  { %v2685_v4 = vmax.f32 %v2677_v3, 0.0  ;;  %v6761_v3 = vpack.c.bf16 %v3310_v60, %v3309_v59 }
 0x9f7   :  { %6266 = vmatprep.mubr.f32.mxu0 %v2685_v4  ;;  %v2992_v4 = vld [vmem:[#allocation2 + $0x318] sm:$0xff] }
 0x9f8   :  { %6267 = vmatmul.mubr.f32.vlgmr.msra.gmra.mrb[30].mxu0 %v2686_v6  ;;  %v3465_v6 = vld [vmem:[#allocation2 + $0x3d0] sm:$0xff] }
 0x9f9   :  { %6744 = vmatpush3.bf16.msra.mxu0 %v6741_v30  ;;  %v6793_v30 = vpack.c.bf16 %v3626_v24, %v3625_v23 }
 0x9fa   :  { %6746 = vmatprep.subr.bf16.mxu0 %v6745_v38 }
 0x9fd   :  { %6748 = vmatpush3.bf16.msra.mxu0 %v6745_v38  ;;  %v3387_v38 = vld [vmem:[#allocation2 + $0x3b8] sm:$0xff] }
 0x9fe   :  { %6758 = vmatprep.subr.bf16.mxu0 %v6757_v44  ;;  %v6765_v39 = vpack.c.bf16 %v3387_v38, %v3386_v37 }
 0xacb   :  { %v6268_v21 = vpop.f32.mrb[30].mxu0 }
 0xacc   :  { %v2779_v25 = vadd.f32 %v6268_v21, %v7227_v63  ;;  %v2769_v7 = vpop.f32.mrb[31].mxu0  ;;  %v3466_v21 = vld [vmem:[#allocation2 + $0x3d8] sm:$0xff] }
 0xacd   :  { %v2778_v8 = vadd.f32 %v2769_v7, %v7229_v0  ;;  %v2993_v7 = vld [vmem:[#allocation2 + $0x320] sm:$0xff] }
 0xace   :  { %v7248_v19 = vadd.f32 %v5632_v26, %v2779_v25  ;;  %v6773_v25 = vpack.c.bf16 %v3466_v21, %v3465_v6 }
 0xacf   :  { %v7250_v5 = vadd.f32 %v5632_v26, %v2778_v8  ;;  %v6725_v26 = vpack.c.bf16 %v2992_v4, %v2991_v1  ;;  %v2994_v8 = vld [vmem:[#allocation2 + $0x328] sm:$0xff] }
 0xad0   :  { %v2792_v20 = vsel %vm138_vm3, %v7248_v19, 0.0 }
 0xad1   :  { %2793 = vadd.xlane.f32.xlu0 %v2792_v20  ;;  %v2789_v9 = vsel %vm138_vm3, %v7250_v5, 0.0  ;;  %v3467_v20 = vld [vmem:[#allocation2 + $0x3e0] sm:$0xff] }
 0xad2   :  { %2790 = vadd.xlane.f32.xlu1 %v2789_v9  ;;  %v3468_v9 = vld [vmem:[#allocation2 + $0x3e8] sm:$0xff] }
 0xb5e   :  { %v2794_v10 = vpop.xlane.xlu0 %2793 }
 0xb5f   :  { %v2796_v11 = vmul.f32 0.03125, %v2794_v10  ;;  %v2791_v22 = vpop.xlane.xlu1 %2790  ;;  %v6729_v10 = vpack.c.bf16 %v2994_v8, %v2993_v7 }
 0xb60   :  { %v2795_v12 = vmul.f32 0.03125, %v2791_v22  ;;  %v3070_v22 = vld [vmem:[#allocation2 + $0x330] sm:$0xff] }
 0xb61   :  { %v2798_v63 = vsub.f32 %v7248_v19, %v2796_v11  ;;  %v6777_v11 = vpack.c.bf16 %v3468_v9, %v3467_v20 }
 0xb62   :  { %v2797_v0 = vsub.f32 %v7250_v5, %v2795_v12  ;;  %v3071_v12 = vld [vmem:[#allocation2 + $0x338] sm:$0xff] }
 0xb63   :  { %v2800_v13 = vmul.f32 %v2798_v63, %v2798_v63 }
 0xb64   :  { %v2799_v14 = vmul.f32 %v2797_v0, %v2797_v0 }
 0xb65   :  { %v2804_v17 = vsel %vm138_vm3, %v2800_v13, 0.0  ;;  %v6733_v13 = vpack.c.bf16 %v3071_v12, %v3070_v22 }
 0xb66   :  { %2805 = vadd.xlane.f32.xlu0 %v2804_v17  ;;  %v2801_v31 = vsel %vm138_vm3, %v2799_v14, 0.0  ;;  %v3072_v17 = vld [vmem:[#allocation2 + $0x340] sm:$0xff] }
 0xb67   :  { %2802 = vadd.xlane.f32.xlu1 %v2801_v31  ;;  %v3073_v31 = vld [vmem:[#allocation2 + $0x348] sm:$0xff] }
 0xb68   :  { %v6737_v27 = vpack.c.bf16 %v3073_v31, %v3072_v17 }
 0xbf3   :  { %v2806_v45 = vpop.xlane.xlu0 %2805 }
 0xbf4   :  { %v2808_v46 = vmul.f32 0.03125, %v2806_v45  ;;  %v2803_v15 = vpop.xlane.xlu1 %2802 }
 0xbf5   :  { %v2807_v16 = vmul.f32 0.03125, %v2803_v15  ;;  %v3547_v15 = vld [vmem:[#allocation2 + $0x408] sm:$0xff] }
 0xbf6   :  { %v2810_v47 = vadd.f32 1e-05, %v2808_v46  ;;  %v3546_v46 = vld [vmem:[#allocation2 + $0x400] sm:$0xff] }
 0xbf7   :  { %v2809_v48 = vadd.f32 1e-05, %v2807_v16  ;;  %v6785_v16 = vpack.c.bf16 %v3547_v15, %v3546_v46 }
 0xbf8   :  { %6911 = vrsqrt.f32 %v2810_v47  ;;  %v3702_v47 = vld [vmem:[#allocation2 + $0x430] sm:$0xff] }
 0xbf9   :  { %6913 = vrsqrt.f32 %v2809_v48  ;;  %v3703_v48 = vld [vmem:[#allocation2 + $0x438] sm:$0xff] }
 0xc02   :  { %v6912_v49 = vpop.eup %6911 }
 0xc03   :  { %v6914_v51 = vpop.eup %6913  ;;  %v2814_v52 = vmul.f32 %v6912_v49, %v2798_v63  ;;  %v3623_v63 = vld [vmem:[#allocation2 + $0x410] sm:$0xff]  ;;  %v6797_v49 = vpack.c.bf16 %v3703_v48, %v3702_v47 }
 0xc04   :  { %v2813_v53 = vmul.f32 %v6914_v51, %v2797_v0  ;;  %v3624_v0 = vld [vmem:[#allocation2 + $0x418] sm:$0xff]  ;;  %v3705_v51 = vld [vmem:[#allocation2 + $0x448] sm:$0xff] }
 0xc05   :  { %v2820_v55 = vmul.f32 %v5633_v50, %v2814_v52  ;;  %v6789_v14 = vpack.c.bf16 %v3624_v0, %v3623_v63 }
 0xc06   :  { %v2819_v56 = vmul.f32 %v5633_v50, %v2813_v53  ;;  %v3704_v50 = vld [vmem:[#allocation2 + $0x440] sm:$0xff] }
 0xc07   :  { %v7262_v62 = vadd.f32 %v5634_v54, %v2820_v55  ;;  %v6801_v52 = vpack.c.bf16 %v3705_v51, %v3704_v50 }
 0xc08   :  { %v7260_v61 = vadd.f32 %v5634_v54, %v2819_v56 }
 0xc0a   :  { %6277 = vmatprep.mubr.msk.f32.mxu1 %vm138_vm3, %v7260_v61  ;;  %6321 = vmatprep.mubr.msk.f32.mxu0 %vm138_vm3, %v7260_v61 }
 0xc0b   :  { %6278 = vmatmul.mubr.msk.f32.vlgmr.msra.gmra.mrb[32].mxu1 %vm138_vm3, %v7262_v62  ;;  %6322 = vmatmul.mubr.msk.f32.vlgmr.msra.gmra.mrb[32].mxu0 %vm138_vm3, %v7262_v62 }
 0xc0c   :  { %6720 = vmatpush3.bf16.msra.mxu1 %v6717_v42  ;;  %6760 = vmatpush3.bf16.msra.mxu0 %v6757_v44  ;;  %v6769_v42 = vpack.c.bf16 %v3389_v41, %v3388_v40  ;;  %v3545_v44 = vld [vmem:[#allocation2 + $0x3f8] sm:$0xff] }
 0xc0d   :  { %6288 = vmatprep.mubr.msk.f32.mxu1 %vm138_vm3, %v7260_v61  ;;  %6343 = vmatprep.mubr.msk.f32.mxu0 %vm138_vm3, %v7260_v61  ;;  %v6781_v45 = vpack.c.bf16 %v3545_v44, %v3544_v43 }
 0xc0e   :  { %6722 = vmatprep.subr.bf16.mxu1 %v6721_v2  ;;  %6762 = vmatprep.subr.bf16.mxu0 %v6761_v3 }
 0xc10   :  { %6724 = vmatpush3.bf16.msra.mxu1 %v6721_v2  ;;  %6764 = vmatpush3.bf16.msra.mxu0 %v6761_v3 }
 0xc11   :  { %6726 = vmatprep.subr.bf16.mxu1 %v6725_v26  ;;  %6774 = vmatprep.subr.bf16.mxu0 %v6773_v25 }
 0xc13   :  { %6289 = vmatmul.mubr.msk.f32.vlgmr.msra.gmra.mrb[34].mxu1 %vm138_vm3, %v7262_v62  ;;  %6344 = vmatmul.mubr.msk.f32.vlgmr.msra.gmra.mrb[34].mxu0 %vm138_vm3, %v7262_v62 }
 0xc14   :  { %6728 = vmatpush3.bf16.msra.mxu1 %v6725_v26  ;;  %6299 = vmatprep.mubr.msk.f32.mxu1 %vm138_vm3, %v7260_v61 }
 0xc15   :  { %6776 = vmatpush3.bf16.msra.mxu0 %v6773_v25  ;;  %6365 = vmatprep.mubr.msk.f32.mxu0 %vm138_vm3, %v7260_v61 }
 0xc16   :  { %6730 = vmatprep.subr.bf16.mxu1 %v6729_v10  ;;  %6778 = vmatprep.subr.bf16.mxu0 %v6777_v11 }
 0xc18   :  { %6732 = vmatpush3.bf16.msra.mxu1 %v6729_v10 }
 0xc19   :  { %6780 = vmatpush3.bf16.msra.mxu0 %v6777_v11  ;;  %6734 = vmatprep.subr.bf16.mxu1 %v6733_v13 }
 0xc1a   :  { %6790 = vmatprep.subr.bf16.mxu0 %v6789_v14 }
 0xc1b   :  { %6300 = vmatmul.mubr.msk.f32.vlgmr.msra.gmra.mrb[36].mxu1 %vm138_vm3, %v7262_v62 }
 0xc1c   :  { %6366 = vmatmul.mubr.msk.f32.vlgmr.msra.gmra.mrb[36].mxu0 %vm138_vm3, %v7262_v62  ;;  %6736 = vmatpush3.bf16.msra.mxu1 %v6733_v13 }
 0xc1d   :  { %6310 = vmatprep.mubr.msk.f32.mxu1 %vm138_vm3, %v7260_v61  ;;  %6792 = vmatpush3.bf16.msra.mxu0 %v6789_v14 }
 0xc1e   :  { %6387 = vmatprep.mubr.msk.f32.mxu0 %vm138_vm3, %v7260_v61  ;;  %6738 = vmatprep.subr.bf16.mxu1 %v6737_v27 }
 0xc1f   :  { %6794 = vmatprep.subr.bf16.mxu0 %v6793_v30 }
 0xc20   :  { %6740 = vmatpush3.bf16.msra.mxu1 %v6737_v27 }
 0xc21   :  { %6796 = vmatpush3.bf16.msra.mxu0 %v6793_v30  ;;  %6750 = vmatprep.subr.bf16.mxu1 %v6749_v33 }
 0xc22   :  { %6401 = vmatprep.subr.mxu0 %v6983_v18 }
 0xc23   :  { %6311 = vmatmul.mubr.msk.f32.vlgmr.msra.gmra.mrb[38].mxu1 %vm138_vm3, %v7262_v62 }
 0xc24   :  { %6388 = vmatmul.mubr.msk.f32.vlgmr.msra.gmra.mrb[38].mxu0 %vm138_vm3, %v7262_v62  ;;  %6752 = vmatpush3.bf16.msra.mxu1 %v6749_v33 }
 0xc25   :  { %6332 = vmatprep.mubr.msk.f32.mxu1 %vm138_vm3, %v7260_v61  ;;  %6754 = vmatprep.subr.bf16.mxu1 %v6753_v36 }
 0xc26   :  { %6403 = vmatprep.mubr.msk.f32.mxu0 %vm6984_vm4, %v6983_v18 }
 0xc28   :  { %6756 = vmatpush3.bf16.msra.mxu1 %v6753_v36 }
 0xc29   :  { %6766 = vmatprep.subr.bf16.mxu1 %v6765_v39 }
 0xc2b   :  { %6333 = vmatmul.mubr.msk.f32.vlgmr.msra.gmra.mrb[40].mxu1 %vm138_vm3, %v7262_v62 }
 0xc2c   :  { %6768 = vmatpush3.bf16.msra.mxu1 %v6765_v39  ;;  %6354 = vmatprep.mubr.msk.f32.mxu1 %vm138_vm3, %v7260_v61 }
 0xc2d   :  { %6770 = vmatprep.subr.bf16.mxu1 %v6769_v42 }
 0xc30   :  { %6772 = vmatpush3.bf16.msra.mxu1 %v6769_v42 }
 0xc31   :  { %6782 = vmatprep.subr.bf16.mxu1 %v6781_v45 }
 0xc33   :  { %6355 = vmatmul.mubr.msk.f32.vlgmr.msra.gmra.mrb[42].mxu1 %vm138_vm3, %v7262_v62 }
 0xc34   :  { %6784 = vmatpush3.bf16.msra.mxu1 %v6781_v45  ;;  %6376 = vmatprep.mubr.msk.f32.mxu1 %vm138_vm3, %v7260_v61 }
 0xc35   :  { %6786 = vmatprep.subr.bf16.mxu1 %v6785_v16 }
 0xc38   :  { %6788 = vmatpush3.bf16.msra.mxu1 %v6785_v16 }
 0xc39   :  { %6798 = vmatprep.subr.bf16.mxu1 %v6797_v49 }
 0xc3b   :  { %6377 = vmatmul.mubr.msk.f32.vlgmr.msra.gmra.mrb[44].mxu1 %vm138_vm3, %v7262_v62 }
 0xc3c   :  { %6800 = vmatpush3.bf16.msra.mxu1 %v6797_v49  ;;  %6398 = vmatprep.mubr.msk.f32.mxu1 %vm138_vm3, %v7260_v61 }
 0xc3d   :  { %6802 = vmatprep.subr.bf16.mxu1 %v6801_v52 }
 0xc40   :  { %6804 = vmatpush3.bf16.msra.mxu1 %v6801_v52 }
 0xc41   :  { %6406 = vmatprep.subr.mxu1 %v6983_v18 }
 0xc43   :  { %6399 = vmatmul.mubr.msk.f32.vlgmr.msra.gmra.mrb[46].mxu1 %vm138_vm3, %v7262_v62 }
 0xc44   :  { %6408 = vmatprep.mubr.msk.f32.mxu1 %vm6984_vm4, %v6983_v18 }
 0xcde   :  { %v6279_v53 = vpop.f32.mrb[32].mxu1  ;;  %v6323_v54 = vpop.f32.mrb[32].mxu0 }
 0xcdf   :  { %v2903_v55 = vpop.f32.mrb[33].mxu1  ;;  %v3219_v56 = vpop.f32.mrb[33].mxu0 }
 0xce6   :  { %v6290_v57 = vpop.f32.mrb[34].mxu1  ;;  %v6345_v58 = vpop.f32.mrb[34].mxu0 }
 0xce7   :  { %v2982_v59 = vpop.f32.mrb[35].mxu1  ;;  %v3377_v60 = vpop.f32.mrb[35].mxu0  ;;  %6407 = vmatpush3.xpose.msk.msra.mxu1 %vm1132_vm5, %v6290_v57 }
 0xce8   :  { %6402 = vmatpush3.xpose.msk.msra.mxu0 %vm1132_vm5, %v2982_v59  ;;  %6416 = vmatprep.subr.mxu1 %v6983_v18 }
 0xce9   :  { %6411 = vmatprep.subr.mxu0 %v6983_v18 }
 0xcea   :  { %6409 = vmatmul.mubr.msk.f32.vlgmr.msra.gmra.mrb[48].mxu1 %vm1132_vm5, %v6279_v53 }
 0xceb   :  { %6404 = vmatmul.mubr.msk.f32.vlgmr.msra.gmra.mrb[40].mxu0 %vm1132_vm5, %v2903_v55  ;;  %6417 = vmatpush3.xpose.msk.msra.mxu1 %vm1132_vm5, %v6323_v54 }
 0xcec   :  { %6412 = vmatpush3.xpose.msk.msra.mxu0 %vm1132_vm5, %v3219_v56  ;;  %6418 = vmatprep.mubr.msk.f32.mxu1 %vm6984_vm4, %v6983_v18 }
 0xced   :  { %6413 = vmatprep.mubr.msk.f32.mxu0 %vm6984_vm4, %v6983_v18  ;;  %6426 = vmatprep.subr.mxu1 %v6983_v18 }
 0xcee   :  { %v6301_v61 = vpop.f32.mrb[36].mxu1  ;;  %6421 = vmatprep.subr.mxu0 %v6983_v18 }
 0xcef   :  { %v7332_v62 = vpop.f32.mrb[36].mxu0  ;;  %v3061_v1 = vpop.f32.mrb[37].mxu1 }
 0xcf0   :  { %v7334_v2 = vpop.f32.mrb[37].mxu0 }
 0xcf6   :  { %v6312_v3 = vpop.f32.mrb[38].mxu1 }
 0xcf7   :  { %v6389_v4 = vpop.f32.mrb[38].mxu0  ;;  %v3140_v6 = vpop.f32.mrb[39].mxu1  ;;  %6419 = vmatmul.mubr.msk.f32.vlgmr.msra.gmra.mrb[50].mxu1 %vm1132_vm5, %v6312_v3 }
 0xcf8   :  { %v3693_v21 = vpop.f32.mrb[39].mxu0  ;;  %6414 = vmatmul.mubr.msk.f32.vlgmr.msra.gmra.mrb[42].mxu0 %vm1132_vm5, %v3140_v6  ;;  %6428 = vmatprep.mubr.msk.f32.mxu1 %vm6984_vm4, %v6983_v18 }
 0xcf9   :  { %6423 = vmatprep.mubr.msk.f32.mxu0 %vm6984_vm4, %v6983_v18 }
 0xcfe   :  { %v7342_v26 = vpop.f32.mrb[40].mxu1 }
 0xcff   :  { %v7344_v25 = vpop.f32.mrb[41].mxu1 }
 0xd06   :  { %v6356_v7 = vpop.f32.mrb[42].mxu1 }
 0xd07   :  { %v3456_v8 = vpop.f32.mrb[43].mxu1  ;;  %6427 = vmatpush3.xpose.msk.msra.mxu1 %vm1132_vm5, %v6356_v7 }
 0xd08   :  { %6422 = vmatpush3.xpose.msk.msra.mxu0 %vm1132_vm5, %v3456_v8  ;;  %6436 = vmatprep.subr.mxu1 %v6983_v18 }
 0xd09   :  { %6431 = vmatprep.subr.mxu0 %v6983_v18 }
 0xd0a   :  { %6429 = vmatmul.mubr.msk.f32.vlgmr.msra.gmra.mrb[52].mxu1 %vm1132_vm5, %v6345_v58 }
 0xd0b   :  { %6424 = vmatmul.mubr.msk.f32.vlgmr.msra.gmra.mrb[44].mxu0 %vm1132_vm5, %v3377_v60  ;;  %6437 = vmatpush3.xpose.msk.msra.mxu1 %vm1132_vm5, %v6389_v4 }
 0xd0c   :  { %6432 = vmatpush3.xpose.msk.msra.mxu0 %vm1132_vm5, %v3693_v21  ;;  %6438 = vmatprep.mubr.msk.f32.mxu1 %vm6984_vm4, %v6983_v18 }
 0xd0d   :  { %6446 = vmatprep.subr.mxu1 %v6983_v18  ;;  %6433 = vmatprep.mubr.msk.f32.mxu0 %vm6984_vm4, %v6983_v18 }
 0xd0e   :  { %v6378_v20 = vpop.f32.mrb[44].mxu1  ;;  %6441 = vmatprep.subr.mxu0 %v6983_v18 }
 0xd0f   :  { %v3614_v9 = vpop.f32.mrb[45].mxu1  ;;  %6439 = vmatmul.mubr.msk.f32.vlgmr.msra.gmra.mrb[54].mxu1 %vm1132_vm5, %v6378_v20 }
 0xd10   :  { %6447 = vmatpush3.msra.mxu1 %v6301_v61  ;;  %6434 = vmatmul.mubr.msk.f32.vlgmr.msra.gmra.mrb[46].mxu0 %vm1132_vm5, %v3614_v9 }
 0xd11   :  { %6442 = vmatpush3.msra.mxu0 %v3061_v1  ;;  %6448 = vmatprep.mubr.msk.f32.mxu1 %vm6984_vm4, %v6983_v18 }
 0xd12   :  { %6456 = vmatprep.subr.mxu1 %v6983_v18  ;;  %6443 = vmatprep.mubr.msk.f32.mxu0 %vm6984_vm4, %v6983_v18 }
 0xd13   :  { %6451 = vmatprep.subr.mxu0 %v6983_v18 }
 0xd16   :  { %v7368_v10 = vpop.f32.mrb[46].mxu1 }
 0xd17   :  { %v7370_v11 = vpop.f32.mrb[47].mxu1 }
 0xdbd   :  { %v3929_v22 = vpop.f32.mrb[48].mxu1 }
 0xdbe   :  { %v4390_v12 = vmul.f32 0.35355338, %v3929_v22  ;;  %v3853_v63 = vpop.f32.mrb[40].mxu0  ;;  %v6410_v0 = vpop.f32.mrb[49].mxu1 }
 0xdbf   :  { %v4389_v13 = vmul.f32 0.35355338, %v3853_v63  ;;  %v6405_v14 = vpop.f32.mrb[41].mxu0 }
 0xdc0   :  { %v4398_v17 = vadd.f32 %v4390_v12, %v7155_v35 }
 0xdc1   :  { %v4397_v31 = vadd.f32 %v4389_v13, %v7155_v35 }
 0xdc2   :  { %v4408_v23 = vsel %vm1132_vm5, %v4398_v17, -inf }
 0xdc3   :  { %4409 = vmax.xlane.f32.xlu0 %v4408_v23  ;;  %v4405_v24 = vsel %vm1132_vm5, %v4397_v31, -inf }
 0xdc4   :  { %4406 = vmax.xlane.f32.xlu1 %v4405_v24 }
 0xdca   :  { %v4081_v27 = vpop.f32.mrb[50].mxu1 }
 0xdcb   :  { %v4392_v28 = vmul.f32 0.35355338, %v4081_v27  ;;  %v4005_v29 = vpop.f32.mrb[42].mxu0  ;;  %v6420_v30 = vpop.f32.mrb[51].mxu1 }
 0xdcc   :  { %v4391_v33 = vmul.f32 0.35355338, %v4005_v29  ;;  %v6415_v34 = vpop.f32.mrb[43].mxu0 }
 0xdcd   :  { %v4400_v32 = vadd.f32 %v4392_v28, %v7155_v35 }
 0xdce   :  { %v4399_v36 = vadd.f32 %v4391_v33, %v7155_v35 }
 0xdcf   :  { %v4414_v37 = vsel %vm1132_vm5, %v4400_v32, -inf }
 0xdd0   :  { %4415 = vmax.xlane.f32.xlu0 %v4414_v37  ;;  %v4411_v38 = vsel %vm1132_vm5, %v4399_v36, -inf }
 0xdd1   :  { %4412 = vmax.xlane.f32.xlu1 %v4411_v38 }
 0xddd   :  { %v4233_v39 = vpop.f32.mrb[52].mxu1 }
 0xdde   :  { %v4394_v40 = vmul.f32 0.35355338, %v4233_v39  ;;  %v4157_v41 = vpop.f32.mrb[44].mxu0  ;;  %v6430_v42 = vpop.f32.mrb[53].mxu1 }
 0xddf   :  { %v4393_v43 = vmul.f32 0.35355338, %v4157_v41  ;;  %v6425_v44 = vpop.f32.mrb[45].mxu0 }
 0xde0   :  { %v4402_v45 = vadd.f32 %v4394_v40, %v7155_v35 }
 0xde1   :  { %v4401_v46 = vadd.f32 %v4393_v43, %v7155_v35 }
 0xde2   :  { %v4385_v15 = vpop.f32.mrb[54].mxu1  ;;  %v4420_v16 = vsel %vm1132_vm5, %v4402_v45, -inf }
 0xde3   :  { %v4396_v47 = vmul.f32 0.35355338, %v4385_v15  ;;  %v4309_v48 = vpop.f32.mrb[46].mxu0  ;;  %4421 = vmax.xlane.f32.xlu0 %v4420_v16  ;;  %v6440_v49 = vpop.f32.mrb[55].mxu1  ;;  %v4417_v50 = vsel %vm1132_vm5, %v4401_v46, -inf }
 0xde4   :  { %v4395_v51 = vmul.f32 0.35355338, %v4309_v48  ;;  %4418 = vmax.xlane.f32.xlu1 %v4417_v50  ;;  %v6435_v52 = vpop.f32.mrb[47].mxu0 }
 0xde5   :  { %v4404_v53 = vadd.f32 %v4396_v47, %v7155_v35 }
 0xde6   :  { %v4403_v54 = vadd.f32 %v4395_v51, %v7155_v35 }
 0xde7   :  { %v4426_v55 = vsel %vm1132_vm5, %v4404_v53, -inf }
 0xde8   :  { %4427 = vmax.xlane.f32.xlu0 %v4426_v55  ;;  %v4423_v56 = vsel %vm1132_vm5, %v4403_v54, -inf }
 0xde9   :  { %4424 = vmax.xlane.f32.xlu1 %v4423_v56 }
 0xe50   :  { %v4410_v57 = vpop.xlane.xlu0 %4409 }
 0xe51   :  { %v4430_v58 = vsub.f32 %v4398_v17, %v4410_v57  ;;  %v4407_v59 = vpop.xlane.xlu1 %4406 }
 0xe52   :  { %v4429_v60 = vsub.f32 %v4397_v31, %v4407_v59 }
 0xe53   :  { %v4439_v61 = vmul.f32 1.442695, %v4430_v58 }
 0xe54   :  { %v4437_v1 = vmul.f32 1.442695, %v4429_v60 }
 0xe55   :  { %6915 = vpow2.f32 %v4439_v61 }
 0xe56   :  { %6917 = vpow2.f32 %v4437_v1 }
 0xe5d   :  { %v4416_v3 = vpop.xlane.xlu0 %4415 }
 0xe5e   :  { %v4432_v4 = vsub.f32 %v4400_v32, %v4416_v3  ;;  %v4413_v6 = vpop.xlane.xlu1 %4412 }
 0xe5f   :  { %v6916_v21 = vpop.eup %6915  ;;  %v4431_v7 = vsub.f32 %v4399_v36, %v4413_v6 }
 0xe60   :  { %v6918_v35 = vpop.eup %6917  ;;  %v4443_v8 = vmul.f32 1.442695, %v4432_v4  ;;  %v4456_v20 = vsel %vm1132_vm5, %v6916_v21, 0.0 }
 0xe61   :  { %v4441_v9 = vmul.f32 1.442695, %v4431_v7  ;;  %4457 = vadd.xlane.f32.xlu0 %v4456_v20  ;;  %v4453_v22 = vsel %vm1132_vm5, %v6918_v35, 0.0  ;;  %v5109_v20 = vld [vmem:[#allocation2 + $0x460] sm:$0xff] }
 0xe62   :  { %6919 = vpow2.f32 %v4443_v8  ;;  %4454 = vadd.xlane.f32.xlu1 %v4453_v22  ;;  %v5108_v8 = vld [vmem:[#allocation2 + $0x458] sm:$0xff] }
 0xe63   :  { %6921 = vpow2.f32 %v4441_v9  ;;  %v5110_v9 = vld [vmem:[#allocation2 + $0x468] sm:$0xff] }
 0xe64   :  { %v6809_v22 = vpack.c.bf16 %v5110_v9, %v5109_v20  ;;  %v5344_v20 = vld [vmem:[#allocation2 + $0x508] sm:$0xff] }
 0xe6c   :  { %v6920_v12 = vpop.eup %6919 }
 0xe6d   :  { %v6922_v63 = vpop.eup %6921  ;;  %v4462_v0 = vsel %vm1132_vm5, %v6920_v12, 0.0 }
 0xe6e   :  { %4463 = vadd.xlane.f32.xlu0 %v4462_v0  ;;  %v4459_v13 = vsel %vm1132_vm5, %v6922_v63, 0.0 }
 0xe6f   :  { %4460 = vadd.xlane.f32.xlu1 %v4459_v13 }
 0xe70   :  { %v4422_v14 = vpop.xlane.xlu0 %4421 }
 0xe71   :  { %v4434_v17 = vsub.f32 %v4402_v45, %v4422_v14  ;;  %v4419_v31 = vpop.xlane.xlu1 %4418 }
 0xe72   :  { %v4433_v23 = vsub.f32 %v4401_v46, %v4419_v31 }
 0xe73   :  { %v4447_v24 = vmul.f32 1.442695, %v4434_v17 }
 0xe74   :  { %v4445_v27 = vmul.f32 1.442695, %v4433_v23 }
 0xe75   :  { %6923 = vpow2.f32 %v4447_v24  ;;  %v4428_v28 = vpop.xlane.xlu0 %4427 }
 0xe76   :  { %6925 = vpow2.f32 %v4445_v27  ;;  %v4436_v29 = vsub.f32 %v4404_v53, %v4428_v28  ;;  %v4425_v30 = vpop.xlane.xlu1 %4424 }
 0xe77   :  { %v4435_v33 = vsub.f32 %v4403_v54, %v4425_v30 }
 0xe78   :  { %v4451_v34 = vmul.f32 1.442695, %v4436_v29 }
 0xe79   :  { %v4449_v32 = vmul.f32 1.442695, %v4435_v33 }
 0xe7a   :  { %6927 = vpow2.f32 %v4451_v34 }
 0xe7b   :  { %6929 = vpow2.f32 %v4449_v32 }
 0xe7f   :  { %v6924_v36 = vpop.eup %6923 }
 0xe80   :  { %v6926_v37 = vpop.eup %6925  ;;  %v4468_v38 = vsel %vm1132_vm5, %v6924_v36, 0.0 }
 0xe81   :  { %4469 = vadd.xlane.f32.xlu0 %v4468_v38  ;;  %v4465_v39 = vsel %vm1132_vm5, %v6926_v37, 0.0 }
 0xe82   :  { %4466 = vadd.xlane.f32.xlu1 %v4465_v39 }
 0xe84   :  { %v6928_v40 = vpop.eup %6927 }
 0xe85   :  { %v6930_v41 = vpop.eup %6929  ;;  %v4474_v42 = vsel %vm1132_vm5, %v6928_v40, 0.0 }
 0xe86   :  { %4475 = vadd.xlane.f32.xlu0 %v4474_v42  ;;  %v4471_v43 = vsel %vm1132_vm5, %v6930_v41, 0.0 }
 0xe87   :  { %4472 = vadd.xlane.f32.xlu1 %v4471_v43 }
 0xeee   :  { %v4458_v44 = vpop.xlane.xlu0 %4457 }
 0xeef   :  { %6931 = vrcp.f32 %v4458_v44  ;;  %v4455_v45 = vpop.xlane.xlu1 %4454 }
 0xef0   :  { %6933 = vrcp.f32 %v4455_v45 }
 0xef9   :  { %v6932_v46 = vpop.eup %6931 }
 0xefa   :  { %v6934_v15 = vpop.eup %6933  ;;  %v4486_v16 = vmul.f32 %v6932_v46, %v6916_v21 }
 0xefb   :  { %v4485_v47 = vmul.f32 %v6934_v15, %v6918_v35  ;;  %v4464_v48 = vpop.xlane.xlu0 %4463  ;;  %v5107_v35 = vld [vmem:[#allocation2 + $0x450] sm:$0xff] }
 0xefc   :  { %6935 = vrcp.f32 %v4464_v48  ;;  %v4461_v49 = vpop.xlane.xlu1 %4460  ;;  %6449 = vmatmul.mubr.msk.f32.vlgmr.msra.gmra.mrb[56].mxu1 %vm1132_vm5, %v4486_v16 }
 0xefd   :  { %6937 = vrcp.f32 %v4461_v49  ;;  %6457 = vmatpush3.msra.mxu1 %v7342_v26  ;;  %6444 = vmatmul.mubr.msk.f32.vlgmr.msra.gmra.mrb[48].mxu0 %vm1132_vm5, %v4485_v47 }
 0xefe   :  { %6452 = vmatpush3.msra.mxu0 %v7344_v25  ;;  %6458 = vmatprep.mubr.msk.f32.mxu1 %vm6984_vm4, %v6983_v18 }
 0xeff   :  { %6466 = vmatprep.subr.mxu1 %v6983_v18  ;;  %6453 = vmatprep.mubr.msk.f32.mxu0 %vm6984_vm4, %v6983_v18 }
 0xf00   :  { %6461 = vmatprep.subr.mxu0 %v6983_v18 }
 0xf06   :  { %v6936_v50 = vpop.eup %6935 }
 0xf07   :  { %v6938_v51 = vpop.eup %6937  ;;  %v4488_v52 = vmul.f32 %v6936_v50, %v6920_v12 }
 0xf08   :  { %v4487_v53 = vmul.f32 %v6938_v51, %v6922_v63 }
 0xf09   :  { %6459 = vmatmul.mubr.msk.f32.vlgmr.msra.gmra.mrb[58].mxu1 %vm1132_vm5, %v4488_v52 }
 0xf0a   :  { %6467 = vmatpush3.msra.mxu1 %v7332_v62  ;;  %6454 = vmatmul.mubr.msk.f32.vlgmr.msra.gmra.mrb[50].mxu0 %vm1132_vm5, %v4487_v53 }
 0xf0b   :  { %6462 = vmatpush3.msra.mxu0 %v7334_v2  ;;  %6468 = vmatprep.mubr.msk.f32.mxu1 %vm6984_vm4, %v6983_v18 }
 0xf0c   :  { %6476 = vmatprep.subr.mxu1 %v6983_v18  ;;  %6463 = vmatprep.mubr.msk.f32.mxu0 %vm6984_vm4, %v6983_v18 }
 0xf0d   :  { %6471 = vmatprep.subr.mxu0 %v6983_v18 }
 0xf0e   :  { %v4470_v26 = vpop.xlane.xlu0 %4469 }
 0xf0f   :  { %6939 = vrcp.f32 %v4470_v26  ;;  %v4467_v25 = vpop.xlane.xlu1 %4466 }
 0xf10   :  { %6941 = vrcp.f32 %v4467_v25  ;;  %v5241_v25 = vld [vmem:[#allocation2 + $0x488] sm:$0xff] }
 0xf13   :  { %v4476_v54 = vpop.xlane.xlu0 %4475 }
 0xf14   :  { %6943 = vrcp.f32 %v4476_v54  ;;  %v4473_v62 = vpop.xlane.xlu1 %4472  ;;  %v5242_v54 = vld [vmem:[#allocation2 + $0x490] sm:$0xff] }
 0xf15   :  { %6945 = vrcp.f32 %v4473_v62  ;;  %v6813_v62 = vpack.c.bf16 %v5242_v54, %v5241_v25 }
 0xf19   :  { %v6940_v55 = vpop.eup %6939 }
 0xf1a   :  { %v6942_v2 = vpop.eup %6941  ;;  %v4490_v56 = vmul.f32 %v6940_v55, %v6924_v36  ;;  %v5243_v55 = vld [vmem:[#allocation2 + $0x498] sm:$0xff] }
 0xf1b   :  { %v4489_v57 = vmul.f32 %v6942_v2, %v6926_v37  ;;  %v5244_v2 = vld [vmem:[#allocation2 + $0x4a0] sm:$0xff] }
 0xf1c   :  { %6469 = vmatmul.mubr.msk.f32.vlgmr.msra.gmra.mrb[60].mxu1 %vm1132_vm5, %v4490_v56  ;;  %v6817_v56 = vpack.c.bf16 %v5244_v2, %v5243_v55 }
 0xf1d   :  { %6477 = vmatpush3.msra.mxu1 %v7368_v10  ;;  %6464 = vmatmul.mubr.msk.f32.vlgmr.msra.gmra.mrb[52].mxu0 %vm1132_vm5, %v4489_v57  ;;  %v5333_v57 = vld [vmem:[#allocation2 + $0x4b0] sm:$0xff] }
 0xf1e   :  { %v6944_v58 = vpop.eup %6943  ;;  %6472 = vmatpush3.msra.mxu0 %v7370_v11  ;;  %6478 = vmatprep.mubr.msk.f32.mxu1 %vm6984_vm4, %v6983_v18 }
 0xf1f   :  { %v6946_v59 = vpop.eup %6945  ;;  %v4492_v60 = vmul.f32 %v6944_v58, %v6928_v40  ;;  %6473 = vmatprep.mubr.msk.f32.mxu0 %vm6984_vm4, %v6983_v18  ;;  %v6805_v18 = vpack.c.bf16 %v5108_v8, %v5107_v35  ;;  %6814 = vmatprep.subr.bf16.mxu1 %v6813_v62  ;;  %v5334_v58 = vld [vmem:[#allocation2 + $0x4b8] sm:$0xff] }
 0xf20   :  { %v4491_v61 = vmul.f32 %v6946_v59, %v6930_v41  ;;  %v5685_v41 = vld [vmem:[#allocation2 + $0x470] ss:$0 sm:$0xff]  ;;  %v5335_v59 = vld [vmem:[#allocation2 + $0x4c0] sm:$0xff]  ;;  %v5342_v35 = vld [vmem:[#allocation2 + $0x4f8] sm:$0xff] }
 0xf21   :  { %6479 = vmatmul.mubr.msk.f32.vlgmr.msra.gmra.mrb[62].mxu1 %vm1132_vm5, %v4492_v60  ;;  %6806 = vmatprep.subr.bf16.mxu0 %v6805_v18  ;;  %v6821_v60 = vpack.c.bf16 %v5334_v58, %v5333_v57 }
 0xf22   :  { %6474 = vmatmul.mubr.msk.f32.vlgmr.msra.gmra.mrb[54].mxu0 %vm1132_vm5, %v4491_v61  ;;  %6816 = vmatpush3.bf16.msra.mxu1 %v6813_v62  ;;  %v5336_v61 = vld [vmem:[#allocation2 + $0x4c8] sm:$0xff] }
 0xf23   :  { %6808 = vmatpush3.bf16.msra.mxu0 %v6805_v18  ;;  %6818 = vmatprep.subr.bf16.mxu1 %v6817_v56  ;;  %v5343_v18 = vld [vmem:[#allocation2 + $0x500] sm:$0xff] }
 0xf24   :  { %6810 = vmatprep.subr.bf16.mxu0 %v6809_v22  ;;  %v6841_v9 = vpack.c.bf16 %v5344_v20, %v5343_v18  ;;  %v5692_v18 = vld [vmem:[#allocation2 + $0x538] ss:$0 sm:$0xff] }
 0xf26   :  { %6820 = vmatpush3.bf16.msra.mxu1 %v6817_v56 }
 0xf27   :  { %6812 = vmatpush3.bf16.msra.mxu0 %v6809_v22  ;;  %v5345_v22 = vld [vmem:[#allocation2 + $0x510] sm:$0xff] }
 0xf28   :  { %6822 = vmatprep.subr.bf16.mxu0 %v6821_v60 }
 0xfcf   :  { %v4635_v1 = vpop.f32.mrb[56].mxu1 }
 0xfd0   :  { %v4562_v10 = vpop.f32.mrb[48].mxu0  ;;  %v6450_v3 = vpop.f32.mrb[57].mxu1 }
 0xfd1   :  { %v6445_v4 = vpop.f32.mrb[49].mxu0  ;;  %v5338_v3 = vld [vmem:[#allocation2 + $0x4d8] sm:$0xff] }
 0xfdc   :  { %v4781_v6 = vpop.f32.mrb[58].mxu1 }
 0xfdd   :  { %v4708_v21 = vpop.f32.mrb[50].mxu0  ;;  %5081 = vrot.lane.b32.xlu0 %v4781_v6, %s6981_s20  ;;  %v6460_v11 = vpop.f32.mrb[59].mxu1  ;;  %v5339_v6 = vld [vmem:[#allocation2 + $0x4e0] sm:$0xff] }
 0xfde   :  { %5079 = vrot.lane.b32.xlu1 %v4708_v21, %s6981_s20  ;;  %v6455_v7 = vpop.f32.mrb[51].mxu0  ;;  %v5340_v21 = vld [vmem:[#allocation2 + $0x4e8] sm:$0xff] }
 0xfdf   :  { %v6833_v11 = vpack.c.bf16 %v5340_v21, %v5339_v6  ;;  %v5341_v7 = vld [vmem:[#allocation2 + $0x4f0] sm:$0xff] }
 0xfe0   :  { %v6837_v8 = vpack.c.bf16 %v5342_v35, %v5341_v7 }
 0xfef   :  { %v4927_v12 = vpop.f32.mrb[60].mxu1 }
 0xff0   :  { %v4854_v63 = vpop.f32.mrb[52].mxu0  ;;  %5089 = vrot.lane.b32.xlu1 %v4927_v12, %s6986_s0  ;;  %v6470_v0 = vpop.f32.mrb[61].mxu1  ;;  %v5346_v12 = vld [vmem:[#allocation2 + $0x518] sm:$0xff] }
 0xff1   :  { %v6465_v13 = vpop.f32.mrb[53].mxu0 }
 0xff4   :  { %5087 = vrot.lane.b32.xlu1 %v4854_v63, %s6986_s0  ;;  %v5073_v14 = vpop.f32.mrb[62].mxu1  ;;  %v6845_v63 = vpack.c.bf16 %v5346_v12, %v5345_v22  ;;  %v5693_v12 = vld [vmem:[#allocation2 + $0x540] ss:$0 sm:$0xff] }
 0xff5   :  { %v5000_v17 = vpop.f32.mrb[54].mxu0  ;;  %v6480_v31 = vpop.f32.mrb[63].mxu1 }
 0xff6   :  { %v6475_v23 = vpop.f32.mrb[55].mxu0  ;;  %5095 = vrot.lane.b32.xlu0 %v5000_v17, %s6987_s1 }
 0xff8   :  { %5097 = vrot.lane.b32.xlu1 %v5073_v14, %s6987_s1 }
0x104f   :  { %v5082_v28 = vpop.permute.xlu0 %5081 }
0x1050   :  { %v5080_v24 = vpop.permute.xlu1 %5079  ;;  %v5102_v32 = vsel %vm1132_vm5, %v4635_v1, %v5082_v28  ;;  %v6825_v1 = vpack.c.bf16 %v5336_v61, %v5335_v59  ;;  %v5473_v59 = vld [vmem:[#allocation2 + $0x548] sm:$0xff] }
0x1051   :  { %v5101_v29 = vsel %vm1132_vm5, %v4562_v10, %v5080_v24  ;;  %v5337_v10 = vld [vmem:[#allocation2 + $0x4d0] sm:$0xff] }
0x1052   :  { %v6829_v4 = vpack.c.bf16 %v5338_v3, %v5337_v10  ;;  %v5476_v10 = vld [vmem:[#allocation2 + $0x560] sm:$0xff] }
0x1062   :  { %v5090_v27 = vpop.permute.xlu1 %5089 }
0x1063   :  { %v5104_v37 = vsel %vm2455_vm7, %v5102_v32, %v5090_v27  ;;  %v5686_v27 = vld [vmem:[#allocation2 + $0x478] ss:$0 sm:$0xff] }
0x1066   :  { %v5088_v30 = vpop.permute.xlu1 %5087 }
0x1067   :  { %v5103_v33 = vsel %vm2455_vm7, %v5101_v29, %v5088_v30  ;;  %v5687_v29 = vld [vmem:[#allocation2 + $0x480] ss:$0 sm:$0xff] }
0x1068   :  { %v5096_v34 = vpop.permute.xlu0 %5095 }
0x1069   :  { %v5105_v36 = vsel %vm2458_vm8, %v5103_v33, %v5096_v34 }
0x106a   :  { %6489 = vmatprep.mubr.msk.f32.mxu0 %vm138_vm3, %v5105_v36  ;;  %v5098_v38 = vpop.permute.xlu1 %5097 }
0x106b   :  { %v5106_v39 = vsel %vm2458_vm8, %v5104_v37, %v5098_v38  ;;  %v5347_v38 = vld [vmem:[#allocation2 + $0x520] sm:$0xff] }
0x106c   :  { %6490 = vmatmul.mubr.msk.f32.vlgmr.msra.gmra.mrb[56].mxu0 %vm138_vm3, %v5106_v39  ;;  %v5348_v39 = vld [vmem:[#allocation2 + $0x528] sm:$0xff] }
0x106d   :  { %6824 = vmatpush3.bf16.msra.mxu0 %v6821_v60  ;;  %v5474_v60 = vld [vmem:[#allocation2 + $0x550] sm:$0xff] }
0x106e   :  { %6826 = vmatprep.subr.bf16.mxu0 %v6825_v1  ;;  %v6853_v61 = vpack.c.bf16 %v5474_v60, %v5473_v59 }
0x1070   :  { %6854 = vmatprep.subr.bf16.mxu1 %v6853_v61 }
0x1071   :  { %6828 = vmatpush3.bf16.msra.mxu0 %v6825_v1  ;;  %v5475_v1 = vld [vmem:[#allocation2 + $0x558] sm:$0xff] }
0x1072   :  { %6830 = vmatprep.subr.bf16.mxu0 %v6829_v4  ;;  %v6857_v3 = vpack.c.bf16 %v5476_v10, %v5475_v1 }
0x1075   :  { %6832 = vmatpush3.bf16.msra.mxu0 %v6829_v4 }
0x1076   :  { %6834 = vmatprep.subr.bf16.mxu0 %v6833_v11 }
0x1079   :  { %6836 = vmatpush3.bf16.msra.mxu0 %v6833_v11 }
0x107a   :  { %6838 = vmatprep.subr.bf16.mxu0 %v6837_v8 }
0x107d   :  { %6840 = vmatpush3.bf16.msra.mxu0 %v6837_v8 }
0x107e   :  { %6842 = vmatprep.subr.bf16.mxu0 %v6841_v9 }
0x1081   :  { %6844 = vmatpush3.bf16.msra.mxu0 %v6841_v9 }
0x1082   :  { %6846 = vmatprep.subr.bf16.mxu0 %v6845_v63 }
0x1085   :  { %6848 = vmatpush3.bf16.msra.mxu0 %v6845_v63 }
0x113f   :  { %v6491_v40 = vpop.f32.mrb[56].mxu0 }
0x1140   :  { %v5193_v42 = vadd.f32 %v6491_v40, %v7248_v19  ;;  %v5183_v43 = vpop.f32.mrb[57].mxu0  ;;  %v6849_v40 = vpack.c.bf16 %v5348_v39, %v5347_v38 }
0x1141   :  { %v5192_v44 = vadd.f32 %v5183_v43, %v7250_v5 }
0x1142   :  { %v7442_v45 = vadd.f32 %v5685_v41, %v5193_v42  ;;  %6850 = vmatprep.subr.bf16.mxu0 %v6849_v40 }
0x1143   :  { %v7444_v46 = vadd.f32 %v5685_v41, %v5192_v44  ;;  %6852 = vmatpush3.bf16.msra.mxu0 %v6849_v40  ;;  %v5688_v41 = vld [vmem:[#allocation2 + $0x4a8] ss:$0 sm:$0xff] }
0x1144   :  { %v5206_v15 = vsel %vm138_vm3, %v7442_v45, 0.0 }
0x1145   :  { %5207 = vadd.xlane.f32.xlu1 %v5206_v15  ;;  %v5203_v16 = vsel %vm138_vm3, %v7444_v46, 0.0 }
0x1146   :  { %5204 = vadd.xlane.f32.xlu0 %v5203_v16 }
0x11d2   :  { %v5208_v47 = vpop.xlane.xlu1 %5207 }
0x11d3   :  { %v5210_v48 = vmul.f32 0.03125, %v5208_v47  ;;  %v5205_v49 = vpop.xlane.xlu0 %5204 }
0x11d4   :  { %v5209_v50 = vmul.f32 0.03125, %v5205_v49  ;;  %v5691_v49 = vld [vmem:[#allocation2 + $0x530] ss:$0 sm:$0xff] }
0x11d5   :  { %v7451_v19 = vsub.f32 %v7442_v45, %v5210_v48 }
0x11d6   :  { %v5211_v5 = vsub.f32 %v7444_v46, %v5209_v50 }
0x11d7   :  { %v5214_v53 = vmul.f32 %v7451_v19, %v7451_v19 }
0x11d8   :  { %v5213_v51 = vmul.f32 %v5211_v5, %v5211_v5 }
0x11d9   :  { %v5218_v26 = vsel %vm138_vm3, %v5214_v53, 0.0 }
0x11da   :  { %v5215_v52 = vsel %vm138_vm3, %v5213_v51, 0.0 }
0x11db   :  { %5216 = vadd.xlane.f32.xlu0 %v5215_v52 }
0x11df   :  { %5219 = vadd.xlane.f32.xlu0 %v5218_v26 }
0x1268   :  { %v5217_v0 = vpop.xlane.xlu0 %5216 }
0x1269   :  { %v5221_v13 = vmul.f32 0.03125, %v5217_v0 }
0x126b   :  { %v5223_v14 = vadd.f32 1e-05, %v5221_v13 }
0x126c   :  { %v5220_v17 = vpop.xlane.xlu0 %5219 }
0x126d   :  { %6947 = vrsqrt.f32 %v5223_v14  ;;  %v5222_v31 = vmul.f32 0.03125, %v5220_v17  ;;  %v5694_v17 = vld [vmem:[#allocation2 + $0x568] ss:$0 sm:$0xff] }
0x126f   :  { %v5224_v23 = vadd.f32 1e-05, %v5222_v31 }
0x1271   :  { %6949 = vrsqrt.f32 %v5224_v23 }
0x1277   :  { %v6948_v24 = vpop.eup %6947 }
0x1278   :  { %v5227_v28 = vmul.f32 %v6948_v24, %v5211_v5 }
0x127a   :  { %v5233_v30 = vmul.f32 %v5686_v27, %v5227_v28 }
0x127b   :  { %v6950_v33 = vpop.eup %6949 }
0x127c   :  { %v5228_v34 = vmul.f32 %v6950_v33, %v7451_v19  ;;  %v5239_v32 = vadd.f32 %v5687_v29, %v5233_v30 }
0x127e   :  { %v5234_v36 = vmul.f32 %v5686_v27, %v5228_v34  ;;  %6500 = vmatprep.mubr.msk.f32.mxu1 %vm138_vm3, %v5239_v32 }
0x1280   :  { %v5240_v37 = vadd.f32 %v5687_v29, %v5234_v36 }
0x1282   :  { %6501 = vmatmul.mubr.msk.f32.vlgmr.msra.gmra.mrb[64].mxu1 %vm138_vm3, %v5240_v37 }
0x1283   :  { %6856 = vmatpush3.bf16.msra.mxu1 %v6853_v61 }
0x1284   :  { %6858 = vmatprep.subr.bf16.mxu1 %v6857_v3 }
0x1287   :  { %6860 = vmatpush3.bf16.msra.mxu1 %v6857_v3 }
0x1355   :  { %v6502_v42 = vpop.f32.mrb[64].mxu1 }
0x1356   :  { %v5328_v43 = vadd.f32 %v6502_v42, %v5688_v41  ;;  %v5322_v44 = vpop.f32.mrb[65].mxu1 }
0x1357   :  { %v5323_v15 = vadd.f32 %v5688_v41, %v5322_v44 }
0x1358   :  { %v5332_v47 = vmax.f32 %v5328_v43, 0.0 }
0x1359   :  { %v5331_v16 = vmax.f32 %v5323_v15, 0.0 }
0x135b   :  { %6535 = vmatprep.mubr.f32.mxu0 %v5331_v16 }
0x135c   :  { %6536 = vmatmul.mubr.f32.vlgmr.msra.gmra.mrb[58].mxu0 %v5332_v47 }
0x142f   :  { %v6537_v48 = vpop.f32.mrb[58].mxu0 }
0x1430   :  { %v5425_v50 = vadd.f32 %v6537_v48, %v7442_v45  ;;  %v5415_v19 = vpop.f32.mrb[59].mxu0 }
0x1431   :  { %v5424_v5 = vadd.f32 %v5415_v19, %v7444_v46 }
0x1432   :  { %v5432_v51 = vadd.f32 %v5691_v49, %v5425_v50 }
0x1433   :  { %v5431_v52 = vadd.f32 %v5691_v49, %v5424_v5 }
0x1434   :  { %v5438_v53 = vsel %vm138_vm3, %v5432_v51, 0.0 }
0x1435   :  { %5439 = vadd.xlane.f32.xlu0 %v5438_v53  ;;  %v5435_v26 = vsel %vm138_vm3, %v5431_v52, 0.0 }
0x1436   :  { %5436 = vadd.xlane.f32.xlu1 %v5435_v26 }
0x14c2   :  { %v5440_v25 = vpop.xlane.xlu0 %5439 }
0x14c3   :  { %v5442_v54 = vmul.f32 0.03125, %v5440_v25  ;;  %v5437_v62 = vpop.xlane.xlu1 %5436 }
0x14c4   :  { %v5441_v55 = vmul.f32 0.03125, %v5437_v62 }
0x14c5   :  { %v5444_v2 = vsub.f32 %v5432_v51, %v5442_v54 }
0x14c6   :  { %v5443_v56 = vsub.f32 %v5431_v52, %v5441_v55 }
0x14c7   :  { %v5446_v57 = vmul.f32 %v5444_v2, %v5444_v2 }
0x14c8   :  { %v5445_v58 = vmul.f32 %v5443_v56, %v5443_v56 }
0x14c9   :  { %v5450_v45 = vsel %vm138_vm3, %v5446_v57, 0.0 }
0x14ca   :  { %5451 = vadd.xlane.f32.xlu0 %v5450_v45  ;;  %v5447_v46 = vsel %vm138_vm3, %v5445_v58, 0.0 }
0x14cb   :  { %5448 = vadd.xlane.f32.xlu1 %v5447_v46 }
0x1557   :  { %v5452_v4 = vpop.xlane.xlu0 %5451 }
0x1558   :  { %v5454_v6 = vmul.f32 0.03125, %v5452_v4  ;;  %v5449_v21 = vpop.xlane.xlu1 %5448 }
0x1559   :  { %v5453_v11 = vmul.f32 0.03125, %v5449_v21 }
0x155a   :  { %v5456_v7 = vadd.f32 1e-05, %v5454_v6 }
0x155b   :  { %v5455_v35 = vadd.f32 1e-05, %v5453_v11 }
0x155c   :  { %6951 = vrsqrt.f32 %v5456_v7 }
0x155d   :  { %6953 = vrsqrt.f32 %v5455_v35 }
0x1566   :  { %v6952_v8 = vpop.eup %6951 }
0x1567   :  { %v6954_v20 = vpop.eup %6953  ;;  %v5460_v9 = vmul.f32 %v6952_v8, %v5444_v2 }
0x1568   :  { %v5459_v22 = vmul.f32 %v6954_v20, %v5443_v56 }
0x1569   :  { %v5466_v63 = vmul.f32 %v5692_v18, %v5460_v9 }
0x156a   :  { %v5465_v0 = vmul.f32 %v5692_v18, %v5459_v22 }
0x156b   :  { %v5472_v14 = vadd.f32 %v5693_v12, %v5466_v63 }
0x156c   :  { %v5471_v13 = vadd.f32 %v5693_v12, %v5465_v0 }
0x156e   :  { %6546 = vmatprep.mubr.msk.f32.mxu1 %vm138_vm3, %v5471_v13 }
0x156f   :  { %6547 = vmatmul.mubr.msk.f32.vlgmr.msra.gmra.mrb[66].mxu1 %vm138_vm3, %v5472_v14 }
0x1642   :  { %v6548_v31 = vpop.f32.mrb[66].mxu1 }
0x1643   :  { %v5560_v23 = vadd.f32 %v6548_v31, %v5694_v17  ;;  %v5554_v24 = vpop.f32.mrb[67].mxu1 }
0x1644   :  { %v5555_v27 = vadd.f32 %v5694_v17, %v5554_v24 }
0x1645   :  { %5564 = vst [vmem:[%s7477_s2 + $0x8] sm:$0xff] %v5560_v23 }
0x1646   :  { %5563 = vst [vmem:[%s7477_s2] sm:$0xff] %v5555_v27 }
0x1647   :  { %5569 = vsyncpa [#allocation3], 1 }

</bundles_post_ra>
